<compile_context>
chip_gen: v6e
topology: v6e:2x2x1
jax: 0.10.0
libtpu: 0.0.40
codegen_flags: <defaults>
</compile_context>

<pallas_src>
import functools

import jax
import jax.numpy as jnp
from jax.experimental import pallas as pl
from jax.experimental.pallas import tpu as pltpu


# ---------------------------------------------------------------------------
# In-kernel math
# ---------------------------------------------------------------------------
def _rational(x, a, b, axis):
    """Safe Pade(5,4) rational activation with per-feature coefficients.

    axis == -1: features on the lane (last) dim.     a: [6, F], b: [4, F], x: [R, F]
    axis ==  0: features on the sublane (first) dim. a: [F, 6], b: [F, 4], x: [F, Cols]
    y = (a0 + a1 x + ... + a5 x^5) / (1 + |b0 x + b1 x^2 + b2 x^3 + b3 x^4|)
    """
    if axis == -1:
        ak = lambda i: a[i:i + 1, :]
        bk = lambda i: b[i:i + 1, :]
    else:
        ak = lambda i: a[:, i:i + 1]
        bk = lambda i: b[:, i:i + 1]
    num = ak(5)
    for i in (4, 3, 2, 1, 0):
        num = num * x + ak(i)
    den = ((bk(3) * x + bk(2)) * x + bk(1)) * x + bk(0)
    den = 1.0 + jnp.abs(den * x)
    # Divide -> EUP reciprocal (frees the VALU slot).
    return num * pl.reciprocal(den, approx=True)


def _mixer_kernel(x_ref,
                  t_a1, t_b1, t_w1t, t_c1, t_a2, t_b2, t_w2t, t_c2,   # KAN1 (token)
                  c_a1, c_b1, c_w1, c_c1, c_a2, c_b2, c_w2, c_c2,     # KAN2 (channel)
                  o_ref, *, skip_param):
    x = x_ref[0].astype(jnp.float32)                                   # [N, C], C on lanes

    # ---- KAN1: token mixing (token axis N on sublanes, weights applied left) ----
    r = _rational(x, t_a1[...], t_b1[...], axis=0)                     # [N, C]
    h = jnp.dot(t_w1t[...], r.astype(jnp.bfloat16),
                preferred_element_type=jnp.float32) + t_c1[...]        # [Hs, C]
    r = _rational(h, t_a2[...], t_b2[...], axis=0)
    y1 = jnp.dot(t_w2t[...], r.astype(jnp.bfloat16),
                 preferred_element_type=jnp.float32) + t_c2[...]       # [N, C]
    y1 = y1 + skip_param * x

    # ---- KAN2: channel mixing (channel axis C on lanes, standard right matmul) ----
    r = _rational(y1, c_a1[...], c_b1[...], axis=-1)                   # [N, C]
    h = jnp.dot(r.astype(jnp.bfloat16), c_w1[...],
                preferred_element_type=jnp.float32) + c_c1[...]        # [N, Hc]
    r = _rational(h, c_a2[...], c_b2[...], axis=-1)
    y2 = jnp.dot(r.astype(jnp.bfloat16), c_w2[...],
                 preferred_element_type=jnp.float32) + c_c2[...]       # [N, C]
    y2 = y2 + skip_param * y1

    o_ref[0] = y2.astype(o_ref.dtype)


# ---------------------------------------------------------------------------
# pallas_call builder
# ---------------------------------------------------------------------------
def _vmem_limit_bytes():
    try:
        cap = int(pltpu.get_tpu_info().vmem_capacity_bytes)
    except Exception:
        cap = 64 * 1024 * 1024          # conservative (v7x physical VMEM per core)
    return (cap * 3) // 4               # leave headroom for compiler scratch


def _build_mixer_call(B, N, C, hidden_s, hidden_c, out_dtype, skip_param,
                      single_buffer_params):
    def const_spec(shape):
        n = len(shape)

        def idx(b):
            return (0,) * n

        if single_buffer_params:
            # Loop-invariant operand: don't double-buffer it.
            return pl.BlockSpec(shape, idx, pipeline_mode=pl.Buffered(1))
        return pl.BlockSpec(shape, idx)

    in_specs = [
        pl.BlockSpec((1, N, C), lambda b: (b, 0, 0)),                  # x
        # KAN1 (token mixing) params: features along sublanes
        const_spec((N, 6)), const_spec((N, 4)),
        const_spec((hidden_s, N)), const_spec((hidden_s, 1)),
        const_spec((hidden_s, 6)), const_spec((hidden_s, 4)),
        const_spec((N, hidden_s)), const_spec((N, 1)),
        # KAN2 (channel mixing) params: features along lanes
        const_spec((6, C)), const_spec((4, C)),
        const_spec((C, hidden_c)), const_spec((1, hidden_c)),
        const_spec((6, hidden_c)), const_spec((4, hidden_c)),
        const_spec((hidden_c, C)), const_spec((1, C)),
    ]

    matmul_flops = 4 * N * C * (hidden_s + hidden_c)
    rat_elems = 2 * N * C + hidden_s * C + N * hidden_c
    w_bytes = 2 * (2 * N * hidden_s + 2 * C * hidden_c)
    coef_bias_bytes = 4 * 11 * (N + hidden_s + C + hidden_c)
    cost = pl.CostEstimate(
        flops=int(B * (matmul_flops + 25 * rat_elems)),
        transcendentals=int(B * rat_elems),
        bytes_accessed=int(8 * B * N * C + w_bytes + coef_bias_bytes),
    )

    return pl.pallas_call(
        functools.partial(_mixer_kernel, skip_param=skip_param),
        out_shape=jax.ShapeDtypeStruct((B, N, C), out_dtype),
        grid=(B,),
        in_specs=in_specs,
        out_specs=pl.BlockSpec((1, N, C), lambda b: (b, 0, 0)),
        compiler_params=pltpu.CompilerParams(
            dimension_semantics=("parallel",),
            vmem_limit_bytes=_vmem_limit_bytes()),
        cost_estimate=cost,
    )


def mixer_layer(x, params, skip_param=1.0):
    B, N, C = x.shape
    k1, k2 = params["kan1"], params["kan2"]
    hidden_s = k1["w1t"].shape[0]
    hidden_c = k2["w1"].shape[1]
    args = (x,
            k1["a1"], k1["b1"], k1["w1t"], k1["c1"],
            k1["a2"], k1["b2"], k1["w2t"], k1["c2"],
            k2["a1"], k2["b1"], k2["w1"], k2["c1"],
            k2["a2"], k2["b2"], k2["w2"], k2["c2"])
    try:
        call = _build_mixer_call(B, N, C, hidden_s, hidden_c, x.dtype, skip_param,
                                 single_buffer_params=True)
        return call(*args)
    except Exception:
        # pipeline_mode=pl.Buffered may be unsupported on this JAX/libtpu build;
        # fall back to default (double-buffered) specs for the invariant params.
        call = _build_mixer_call(B, N, C, hidden_s, hidden_c, x.dtype, skip_param,
                                 single_buffer_params=False)
        return call(*args)


# ---------------------------------------------------------------------------
# Deterministic parameter construction (glue, plain JAX)
# ---------------------------------------------------------------------------
def _gr_kan_coeffs(num_features, groups, mode, features_axis):
    if mode == "identity":
        num = jnp.array([0.0, 1.0, 0.0, 0.0, 0.0, 0.0], jnp.float32)
        den = jnp.array([0.0, 0.0, 0.0, 0.0], jnp.float32)
    else:  # Pade(5,4) coefficients fitted to GELU (KAT 'gelu' init)
        num = jnp.array([-0.0012423594497499122, 0.5080497063245629,
                         0.41586363182937475, 0.13022718688035761,
                         0.024355900098993424, 0.00290283948155535], jnp.float32)
        den = jnp.array([-0.06675015696494944, 0.17927646217001553,
                         0.03746682605496631, 1.6561610853276082e-10], jnp.float32)
    gsize = num_features // groups
    a = jnp.repeat(jnp.tile(num[:, None], (1, groups)), gsize, axis=1)  # [6, F]
    b = jnp.repeat(jnp.tile(den[:, None], (1, groups)), gsize, axis=1)  # [4, F]
    if features_axis == 0:
        a, b = a.T, b.T                                                 # [F, 6], [F, 4]
    return a, b


def _linear(key, fan_in, fan_out):
    kw, kb = jax.random.split(key)
    bound = 1.0 / float(fan_in) ** 0.5
    # PyTorch nn.Linear stores [out, in]; we store [in, out] and transpose as needed.
    w = jax.random.uniform(kw, (fan_in, fan_out), jnp.float32, -bound, bound)
    b = jax.random.uniform(kb, (fan_out,), jnp.float32, -bound, bound)
    return w, b


def init_mixer_params(key, num_patches, hidden_size, hidden_s, hidden_c, groups=4):
    k1, k2, k3, k4 = jax.random.split(key, 4)

    # KAN1: KAT(in=num_patches, hidden=hidden_s, out=num_patches) along the token axis.
    a1, b1 = _gr_kan_coeffs(num_patches, groups, "identity", features_axis=0)
    a2, b2 = _gr_kan_coeffs(hidden_s, groups, "gelu", features_axis=0)
    w1, c1 = _linear(k1, num_patches, hidden_s)
    w2, c2 = _linear(k2, hidden_s, num_patches)
    kan1 = dict(a1=a1, b1=b1,
                w1t=w1.T.astype(jnp.bfloat16), c1=c1[:, None],   # [Hs, N], [Hs, 1]
                a2=a2, b2=b2,
                w2t=w2.T.astype(jnp.bfloat16), c2=c2[:, None])   # [N, Hs], [N, 1]

    # KAN2: KAT(in=hidden_size, hidden=hidden_c, out=hidden_size) along the channel axis.
    a3, b3 = _gr_kan_coeffs(hidden_size, groups, "identity", features_axis=-1)
    a4, b4 = _gr_kan_coeffs(hidden_c, groups, "gelu", features_axis=-1)
    w3, c3 = _linear(k3, hidden_size, hidden_c)
    w4, c4 = _linear(k4, hidden_c, hidden_size)
    kan2 = dict(a1=a3, b1=b3,
                w1=w3.astype(jnp.bfloat16), c1=c3[None, :],      # [C, Hc], [1, Hc]
                a2=a4, b2=b4,
                w2=w4.astype(jnp.bfloat16), c2=c4[None, :])      # [Hc, C], [1, C]
    return dict(kan1=kan1, kan2=kan2)


# ---------------------------------------------------------------------------
# Pure-JAX reference (same math, exact divide) for correctness checking
# ---------------------------------------------------------------------------
def _rational_host(x, a, b, axis):
    if axis == -1:
        ak = lambda i: a[i:i + 1, :]
        bk = lambda i: b[i:i + 1, :]
    else:
        ak = lambda i: a[:, i:i + 1]
        bk = lambda i: b[:, i:i + 1]
    num = ak(5)
    for i in (4, 3, 2, 1, 0):
        num = num * x + ak(i)
    den = ((bk(3) * x + bk(2)) * x + bk(1)) * x + bk(0)
    return num / (1.0 + jnp.abs(den * x))


def mixer_layer_ref(x, params, skip_param=1.0):
    k1, k2 = params["kan1"], params["kan2"]

    def one(x2d):
        x2d = x2d.astype(jnp.float32)
        r = _rational_host(x2d, k1["a1"], k1["b1"], axis=0)
        h = jnp.dot(k1["w1t"], r.astype(jnp.bfloat16),
                    preferred_element_type=jnp.float32) + k1["c1"]
        r = _rational_host(h, k1["a2"], k1["b2"], axis=0)
        y1 = jnp.dot(k1["w2t"], r.astype(jnp.bfloat16),
                     preferred_element_type=jnp.float32) + k1["c2"] + skip_param * x2d
        r = _rational_host(y1, k2["a1"], k2["b1"], axis=-1)
        h = jnp.dot(r.astype(jnp.bfloat16), k2["w1"],
                    preferred_element_type=jnp.float32) + k2["c1"]
        r = _rational_host(h, k2["a2"], k2["b2"], axis=-1)
        y2 = jnp.dot(r.astype(jnp.bfloat16), k2["w2"],
                     preferred_element_type=jnp.float32) + k2["c2"] + skip_param * y1
        return y2

    return jax.vmap(one)(x)


if __name__ == "__main__":
    B, num_patches, hidden_size = 2, 8, 32
    hidden_s, hidden_c = 16, 64
    skip_param = 1.0
    # drop_p only matters in training mode (dropout == identity at eval).

    key = jax.random.PRNGKey(0)
    kx, kp = jax.random.split(key)
    x = jax.random.normal(kx, (B, num_patches, hidden_size), jnp.float32)
    params = init_mixer_params(kp, num_patches, hidden_size, hidden_s, hidden_c,
                               groups=4)

    y = mixer_layer(x, params, skip_param)
    jax.block_until_ready(y)

    assert y.shape == (B, num_patches, hidden_size)
    assert bool(jnp.all(jnp.isfinite(y)))
    y_ref = mixer_layer_ref(x, params, skip_param)
    err = float(jnp.max(jnp.abs(y - y_ref)))
    assert err < 1e-1, f"mismatch vs pure-JAX reference: {err}"
    print("KERNEL_OK")
</pallas_src>

<mosaic_0001>
module attributes {stable_mosaic.version = 11 : i64} {
  func.func @_mixer_kernel(%arg0: i32, %arg1: memref<1x8x32xf32, #tpu.memory_space<vmem>>, %arg2: memref<8x6xf32, #tpu.memory_space<vmem>>, %arg3: memref<8x4xf32, #tpu.memory_space<vmem>>, %arg4: memref<16x8xbf16, #tpu.memory_space<vmem>>, %arg5: memref<16x1xf32, #tpu.memory_space<vmem>>, %arg6: memref<16x6xf32, #tpu.memory_space<vmem>>, %arg7: memref<16x4xf32, #tpu.memory_space<vmem>>, %arg8: memref<8x16xbf16, #tpu.memory_space<vmem>>, %arg9: memref<8x1xf32, #tpu.memory_space<vmem>>, %arg10: memref<6x32xf32, #tpu.memory_space<vmem>>, %arg11: memref<4x32xf32, #tpu.memory_space<vmem>>, %arg12: memref<32x64xbf16, #tpu.memory_space<vmem>>, %arg13: memref<1x64xf32, #tpu.memory_space<vmem>>, %arg14: memref<6x64xf32, #tpu.memory_space<vmem>>, %arg15: memref<4x64xf32, #tpu.memory_space<vmem>>, %arg16: memref<64x32xbf16, #tpu.memory_space<vmem>>, %arg17: memref<1x32xf32, #tpu.memory_space<vmem>>, %arg18: memref<1x8x32xf32, #tpu.memory_space<vmem>>) attributes {dimension_semantics = [#tpu.dimension_semantics<parallel>], iteration_bounds = array<i64: 2>, scalar_prefetch = 0 : i64, scratch_operands = 0 : i64, tpu.core_type = #tpu.core_type<tc>, window_params = [{transform_indices = @transform_0, window_bounds = array<i64: 1, 8, 32>}, {pipeline_mode = #tpu.pipeline_mode<synchronous>, transform_indices = @transform_1, window_bounds = array<i64: 8, 6>}, {pipeline_mode = #tpu.pipeline_mode<synchronous>, transform_indices = @transform_2, window_bounds = array<i64: 8, 4>}, {pipeline_mode = #tpu.pipeline_mode<synchronous>, transform_indices = @transform_3, window_bounds = array<i64: 16, 8>}, {pipeline_mode = #tpu.pipeline_mode<synchronous>, transform_indices = @transform_4, window_bounds = array<i64: 16, 1>}, {pipeline_mode = #tpu.pipeline_mode<synchronous>, transform_indices = @transform_5, window_bounds = array<i64: 16, 6>}, {pipeline_mode = #tpu.pipeline_mode<synchronous>, transform_indices = @transform_6, window_bounds = array<i64: 16, 4>}, {pipeline_mode = #tpu.pipeline_mode<synchronous>, transform_indices = @transform_7, window_bounds = array<i64: 8, 16>}, {pipeline_mode = #tpu.pipeline_mode<synchronous>, transform_indices = @transform_8, window_bounds = array<i64: 8, 1>}, {pipeline_mode = #tpu.pipeline_mode<synchronous>, transform_indices = @transform_9, window_bounds = array<i64: 6, 32>}, {pipeline_mode = #tpu.pipeline_mode<synchronous>, transform_indices = @transform_10, window_bounds = array<i64: 4, 32>}, {pipeline_mode = #tpu.pipeline_mode<synchronous>, transform_indices = @transform_11, window_bounds = array<i64: 32, 64>}, {pipeline_mode = #tpu.pipeline_mode<synchronous>, transform_indices = @transform_12, window_bounds = array<i64: 1, 64>}, {pipeline_mode = #tpu.pipeline_mode<synchronous>, transform_indices = @transform_13, window_bounds = array<i64: 6, 64>}, {pipeline_mode = #tpu.pipeline_mode<synchronous>, transform_indices = @transform_14, window_bounds = array<i64: 4, 64>}, {pipeline_mode = #tpu.pipeline_mode<synchronous>, transform_indices = @transform_15, window_bounds = array<i64: 64, 32>}, {pipeline_mode = #tpu.pipeline_mode<synchronous>, transform_indices = @transform_16, window_bounds = array<i64: 1, 32>}, {transform_indices = @transform_17, window_bounds = array<i64: 1, 8, 32>}]} {
    %c0 = arith.constant 0 : index
    %c0_0 = arith.constant 0 : index
    %c0_1 = arith.constant 0 : index
    %0 = vector.load %arg1[%c0, %c0_0, %c0_1] : memref<1x8x32xf32, #tpu.memory_space<vmem>>, vector<1x8x32xf32>
    %1 = vector.shape_cast %0 : vector<1x8x32xf32> to vector<8x32xf32>
    %c0_2 = arith.constant 0 : index
    %c0_3 = arith.constant 0 : index
    %2 = vector.load %arg2[%c0_2, %c0_3] : memref<8x6xf32, #tpu.memory_space<vmem>>, vector<8x6xf32>
    %c0_4 = arith.constant 0 : index
    %c0_5 = arith.constant 0 : index
    %3 = vector.load %arg3[%c0_4, %c0_5] : memref<8x4xf32, #tpu.memory_space<vmem>>, vector<8x4xf32>
    %4 = vector.extract_strided_slice %2 {offsets = [0, 5], sizes = [8, 1], strides = [1, 1]} : vector<8x6xf32> to vector<8x1xf32>
    %5 = vector.broadcast %4 : vector<8x1xf32> to vector<8x32xf32>
    %6 = arith.mulf %5, %1 : vector<8x32xf32>
    %7 = vector.extract_strided_slice %2 {offsets = [0, 4], sizes = [8, 1], strides = [1, 1]} : vector<8x6xf32> to vector<8x1xf32>
    %8 = vector.broadcast %7 : vector<8x1xf32> to vector<8x32xf32>
    %9 = arith.addf %6, %8 : vector<8x32xf32>
    %10 = arith.mulf %9, %1 : vector<8x32xf32>
    %11 = vector.extract_strided_slice %2 {offsets = [0, 3], sizes = [8, 1], strides = [1, 1]} : vector<8x6xf32> to vector<8x1xf32>
    %12 = vector.broadcast %11 : vector<8x1xf32> to vector<8x32xf32>
    %13 = arith.addf %10, %12 : vector<8x32xf32>
    %14 = arith.mulf %13, %1 : vector<8x32xf32>
    %15 = vector.extract_strided_slice %2 {offsets = [0, 2], sizes = [8, 1], strides = [1, 1]} : vector<8x6xf32> to vector<8x1xf32>
    %16 = vector.broadcast %15 : vector<8x1xf32> to vector<8x32xf32>
    %17 = arith.addf %14, %16 : vector<8x32xf32>
    %18 = arith.mulf %17, %1 : vector<8x32xf32>
    %19 = vector.extract_strided_slice %2 {offsets = [0, 1], sizes = [8, 1], strides = [1, 1]} : vector<8x6xf32> to vector<8x1xf32>
    %20 = vector.broadcast %19 : vector<8x1xf32> to vector<8x32xf32>
    %21 = arith.addf %18, %20 : vector<8x32xf32>
    %22 = arith.mulf %21, %1 : vector<8x32xf32>
    %23 = vector.extract_strided_slice %2 {offsets = [0, 0], sizes = [8, 1], strides = [1, 1]} : vector<8x6xf32> to vector<8x1xf32>
    %24 = vector.broadcast %23 : vector<8x1xf32> to vector<8x32xf32>
    %25 = arith.addf %22, %24 : vector<8x32xf32>
    %26 = vector.extract_strided_slice %3 {offsets = [0, 3], sizes = [8, 1], strides = [1, 1]} : vector<8x4xf32> to vector<8x1xf32>
    %27 = vector.broadcast %26 : vector<8x1xf32> to vector<8x32xf32>
    %28 = arith.mulf %27, %1 : vector<8x32xf32>
    %29 = vector.extract_strided_slice %3 {offsets = [0, 2], sizes = [8, 1], strides = [1, 1]} : vector<8x4xf32> to vector<8x1xf32>
    %30 = vector.broadcast %29 : vector<8x1xf32> to vector<8x32xf32>
    %31 = arith.addf %28, %30 : vector<8x32xf32>
    %32 = arith.mulf %31, %1 : vector<8x32xf32>
    %33 = vector.extract_strided_slice %3 {offsets = [0, 1], sizes = [8, 1], strides = [1, 1]} : vector<8x4xf32> to vector<8x1xf32>
    %34 = vector.broadcast %33 : vector<8x1xf32> to vector<8x32xf32>
    %35 = arith.addf %32, %34 : vector<8x32xf32>
    %36 = arith.mulf %35, %1 : vector<8x32xf32>
    %37 = vector.extract_strided_slice %3 {offsets = [0, 0], sizes = [8, 1], strides = [1, 1]} : vector<8x4xf32> to vector<8x1xf32>
    %38 = vector.broadcast %37 : vector<8x1xf32> to vector<8x32xf32>
    %39 = arith.addf %36, %38 : vector<8x32xf32>
    %40 = arith.mulf %39, %1 : vector<8x32xf32>
    %41 = math.absf %40 : vector<8x32xf32>
    %cst = arith.constant 1.000000e+00 : f32
    %42 = vector.broadcast %cst : f32 to vector<8x32xf32>
    %43 = arith.addf %42, %41 : vector<8x32xf32>
    %44 = tpu.reciprocal %43 {approx = true} : vector<8x32xf32> -> vector<8x32xf32>
    %45 = arith.mulf %25, %44 : vector<8x32xf32>
    %c0_6 = arith.constant 0 : index
    %c0_7 = arith.constant 0 : index
    %46 = vector.load %arg4[%c0_6, %c0_7] : memref<16x8xbf16, #tpu.memory_space<vmem>>, vector<16x8xbf16>
    %47 = arith.truncf %45 : vector<8x32xf32> to vector<8x32xbf16>
    %cst_8 = arith.constant dense<0.000000e+00> : vector<16x32xf32>
    %48 = tpu.matmul %46, %47, %cst_8 {dimension_numbers = #tpu.dot_dimension_numbers<[1], [0], [0], [1], [0, 0, 1, 1], [], []>} : vector<16x8xbf16>, vector<8x32xbf16>, vector<16x32xf32> -> vector<16x32xf32>
    %c0_9 = arith.constant 0 : index
    %c0_10 = arith.constant 0 : index
    %49 = vector.load %arg5[%c0_9, %c0_10] : memref<16x1xf32, #tpu.memory_space<vmem>>, vector<16x1xf32>
    %50 = vector.broadcast %49 : vector<16x1xf32> to vector<16x32xf32>
    %51 = arith.addf %48, %50 : vector<16x32xf32>
    %c0_11 = arith.constant 0 : index
    %c0_12 = arith.constant 0 : index
    %52 = vector.load %arg6[%c0_11, %c0_12] : memref<16x6xf32, #tpu.memory_space<vmem>>, vector<16x6xf32>
    %c0_13 = arith.constant 0 : index
    %c0_14 = arith.constant 0 : index
    %53 = vector.load %arg7[%c0_13, %c0_14] : memref<16x4xf32, #tpu.memory_space<vmem>>, vector<16x4xf32>
    %54 = vector.extract_strided_slice %52 {offsets = [0, 5], sizes = [16, 1], strides = [1, 1]} : vector<16x6xf32> to vector<16x1xf32>
    %55 = vector.broadcast %54 : vector<16x1xf32> to vector<16x32xf32>
    %56 = arith.mulf %55, %51 : vector<16x32xf32>
    %57 = vector.extract_strided_slice %52 {offsets = [0, 4], sizes = [16, 1], strides = [1, 1]} : vector<16x6xf32> to vector<16x1xf32>
    %58 = vector.broadcast %57 : vector<16x1xf32> to vector<16x32xf32>
    %59 = arith.addf %56, %58 : vector<16x32xf32>
    %60 = arith.mulf %59, %51 : vector<16x32xf32>
    %61 = vector.extract_strided_slice %52 {offsets = [0, 3], sizes = [16, 1], strides = [1, 1]} : vector<16x6xf32> to vector<16x1xf32>
    %62 = vector.broadcast %61 : vector<16x1xf32> to vector<16x32xf32>
    %63 = arith.addf %60, %62 : vector<16x32xf32>
    %64 = arith.mulf %63, %51 : vector<16x32xf32>
    %65 = vector.extract_strided_slice %52 {offsets = [0, 2], sizes = [16, 1], strides = [1, 1]} : vector<16x6xf32> to vector<16x1xf32>
    %66 = vector.broadcast %65 : vector<16x1xf32> to vector<16x32xf32>
    %67 = arith.addf %64, %66 : vector<16x32xf32>
    %68 = arith.mulf %67, %51 : vector<16x32xf32>
    %69 = vector.extract_strided_slice %52 {offsets = [0, 1], sizes = [16, 1], strides = [1, 1]} : vector<16x6xf32> to vector<16x1xf32>
    %70 = vector.broadcast %69 : vector<16x1xf32> to vector<16x32xf32>
    %71 = arith.addf %68, %70 : vector<16x32xf32>
    %72 = arith.mulf %71, %51 : vector<16x32xf32>
    %73 = vector.extract_strided_slice %52 {offsets = [0, 0], sizes = [16, 1], strides = [1, 1]} : vector<16x6xf32> to vector<16x1xf32>
    %74 = vector.broadcast %73 : vector<16x1xf32> to vector<16x32xf32>
    %75 = arith.addf %72, %74 : vector<16x32xf32>
    %76 = vector.extract_strided_slice %53 {offsets = [0, 3], sizes = [16, 1], strides = [1, 1]} : vector<16x4xf32> to vector<16x1xf32>
    %77 = vector.broadcast %76 : vector<16x1xf32> to vector<16x32xf32>
    %78 = arith.mulf %77, %51 : vector<16x32xf32>
    %79 = vector.extract_strided_slice %53 {offsets = [0, 2], sizes = [16, 1], strides = [1, 1]} : vector<16x4xf32> to vector<16x1xf32>
    %80 = vector.broadcast %79 : vector<16x1xf32> to vector<16x32xf32>
    %81 = arith.addf %78, %80 : vector<16x32xf32>
    %82 = arith.mulf %81, %51 : vector<16x32xf32>
    %83 = vector.extract_strided_slice %53 {offsets = [0, 1], sizes = [16, 1], strides = [1, 1]} : vector<16x4xf32> to vector<16x1xf32>
    %84 = vector.broadcast %83 : vector<16x1xf32> to vector<16x32xf32>
    %85 = arith.addf %82, %84 : vector<16x32xf32>
    %86 = arith.mulf %85, %51 : vector<16x32xf32>
    %87 = vector.extract_strided_slice %53 {offsets = [0, 0], sizes = [16, 1], strides = [1, 1]} : vector<16x4xf32> to vector<16x1xf32>
    %88 = vector.broadcast %87 : vector<16x1xf32> to vector<16x32xf32>
    %89 = arith.addf %86, %88 : vector<16x32xf32>
    %90 = arith.mulf %89, %51 : vector<16x32xf32>
    %91 = math.absf %90 : vector<16x32xf32>
    %cst_15 = arith.constant 1.000000e+00 : f32
    %92 = vector.broadcast %cst_15 : f32 to vector<16x32xf32>
    %93 = arith.addf %92, %91 : vector<16x32xf32>
    %94 = tpu.reciprocal %93 {approx = true} : vector<16x32xf32> -> vector<16x32xf32>
    %95 = arith.mulf %75, %94 : vector<16x32xf32>
    %c0_16 = arith.constant 0 : index
    %c0_17 = arith.constant 0 : index
    %96 = vector.load %arg8[%c0_16, %c0_17] : memref<8x16xbf16, #tpu.memory_space<vmem>>, vector<8x16xbf16>
    %97 = arith.truncf %95 : vector<16x32xf32> to vector<16x32xbf16>
    %cst_18 = arith.constant dense<0.000000e+00> : vector<8x32xf32>
    %98 = tpu.matmul %96, %97, %cst_18 {dimension_numbers = #tpu.dot_dimension_numbers<[1], [0], [0], [1], [0, 0, 1, 1], [], []>} : vector<8x16xbf16>, vector<16x32xbf16>, vector<8x32xf32> -> vector<8x32xf32>
    %c0_19 = arith.constant 0 : index
    %c0_20 = arith.constant 0 : index
    %99 = vector.load %arg9[%c0_19, %c0_20] : memref<8x1xf32, #tpu.memory_space<vmem>>, vector<8x1xf32>
    %100 = vector.broadcast %99 : vector<8x1xf32> to vector<8x32xf32>
    %101 = arith.addf %98, %100 : vector<8x32xf32>
    %cst_21 = arith.constant 1.000000e+00 : f32
    %102 = vector.broadcast %cst_21 : f32 to vector<8x32xf32>
    %103 = arith.mulf %102, %1 : vector<8x32xf32>
    %104 = arith.addf %101, %103 : vector<8x32xf32>
    %c0_22 = arith.constant 0 : index
    %c0_23 = arith.constant 0 : index
    %105 = vector.load %arg10[%c0_22, %c0_23] : memref<6x32xf32, #tpu.memory_space<vmem>>, vector<6x32xf32>
    %c0_24 = arith.constant 0 : index
    %c0_25 = arith.constant 0 : index
    %106 = vector.load %arg11[%c0_24, %c0_25] : memref<4x32xf32, #tpu.memory_space<vmem>>, vector<4x32xf32>
    %107 = vector.extract_strided_slice %105 {offsets = [5, 0], sizes = [1, 32], strides = [1, 1]} : vector<6x32xf32> to vector<1x32xf32>
    %108 = vector.broadcast %107 : vector<1x32xf32> to vector<8x32xf32>
    %109 = arith.mulf %108, %104 : vector<8x32xf32>
    %110 = vector.extract_strided_slice %105 {offsets = [4, 0], sizes = [1, 32], strides = [1, 1]} : vector<6x32xf32> to vector<1x32xf32>
    %111 = vector.broadcast %110 : vector<1x32xf32> to vector<8x32xf32>
    %112 = arith.addf %109, %111 : vector<8x32xf32>
    %113 = arith.mulf %112, %104 : vector<8x32xf32>
    %114 = vector.extract_strided_slice %105 {offsets = [3, 0], sizes = [1, 32], strides = [1, 1]} : vector<6x32xf32> to vector<1x32xf32>
    %115 = vector.broadcast %114 : vector<1x32xf32> to vector<8x32xf32>
    %116 = arith.addf %113, %115 : vector<8x32xf32>
    %117 = arith.mulf %116, %104 : vector<8x32xf32>
    %118 = vector.extract_strided_slice %105 {offsets = [2, 0], sizes = [1, 32], strides = [1, 1]} : vector<6x32xf32> to vector<1x32xf32>
    %119 = vector.broadcast %118 : vector<1x32xf32> to vector<8x32xf32>
    %120 = arith.addf %117, %119 : vector<8x32xf32>
    %121 = arith.mulf %120, %104 : vector<8x32xf32>
    %122 = vector.extract_strided_slice %105 {offsets = [1, 0], sizes = [1, 32], strides = [1, 1]} : vector<6x32xf32> to vector<1x32xf32>
    %123 = vector.broadcast %122 : vector<1x32xf32> to vector<8x32xf32>
    %124 = arith.addf %121, %123 : vector<8x32xf32>
    %125 = arith.mulf %124, %104 : vector<8x32xf32>
    %126 = vector.extract_strided_slice %105 {offsets = [0, 0], sizes = [1, 32], strides = [1, 1]} : vector<6x32xf32> to vector<1x32xf32>
    %127 = vector.broadcast %126 : vector<1x32xf32> to vector<8x32xf32>
    %128 = arith.addf %125, %127 : vector<8x32xf32>
    %129 = vector.extract_strided_slice %106 {offsets = [3, 0], sizes = [1, 32], strides = [1, 1]} : vector<4x32xf32> to vector<1x32xf32>
    %130 = vector.broadcast %129 : vector<1x32xf32> to vector<8x32xf32>
    %131 = arith.mulf %130, %104 : vector<8x32xf32>
    %132 = vector.extract_strided_slice %106 {offsets = [2, 0], sizes = [1, 32], strides = [1, 1]} : vector<4x32xf32> to vector<1x32xf32>
    %133 = vector.broadcast %132 : vector<1x32xf32> to vector<8x32xf32>
    %134 = arith.addf %131, %133 : vector<8x32xf32>
    %135 = arith.mulf %134, %104 : vector<8x32xf32>
    %136 = vector.extract_strided_slice %106 {offsets = [1, 0], sizes = [1, 32], strides = [1, 1]} : vector<4x32xf32> to vector<1x32xf32>
    %137 = vector.broadcast %136 : vector<1x32xf32> to vector<8x32xf32>
    %138 = arith.addf %135, %137 : vector<8x32xf32>
    %139 = arith.mulf %138, %104 : vector<8x32xf32>
    %140 = vector.extract_strided_slice %106 {offsets = [0, 0], sizes = [1, 32], strides = [1, 1]} : vector<4x32xf32> to vector<1x32xf32>
    %141 = vector.broadcast %140 : vector<1x32xf32> to vector<8x32xf32>
    %142 = arith.addf %139, %141 : vector<8x32xf32>
    %143 = arith.mulf %142, %104 : vector<8x32xf32>
    %144 = math.absf %143 : vector<8x32xf32>
    %cst_26 = arith.constant 1.000000e+00 : f32
    %145 = vector.broadcast %cst_26 : f32 to vector<8x32xf32>
    %146 = arith.addf %145, %144 : vector<8x32xf32>
    %147 = tpu.reciprocal %146 {approx = true} : vector<8x32xf32> -> vector<8x32xf32>
    %148 = arith.mulf %128, %147 : vector<8x32xf32>
    %149 = arith.truncf %148 : vector<8x32xf32> to vector<8x32xbf16>
    %c0_27 = arith.constant 0 : index
    %c0_28 = arith.constant 0 : index
    %150 = vector.load %arg12[%c0_27, %c0_28] : memref<32x64xbf16, #tpu.memory_space<vmem>>, vector<32x64xbf16>
    %cst_29 = arith.constant dense<0.000000e+00> : vector<8x64xf32>
    %151 = tpu.matmul %149, %150, %cst_29 {dimension_numbers = #tpu.dot_dimension_numbers<[1], [0], [0], [1], [0, 0, 1, 1], [], []>} : vector<8x32xbf16>, vector<32x64xbf16>, vector<8x64xf32> -> vector<8x64xf32>
    %c0_30 = arith.constant 0 : index
    %c0_31 = arith.constant 0 : index
    %152 = vector.load %arg13[%c0_30, %c0_31] : memref<1x64xf32, #tpu.memory_space<vmem>>, vector<1x64xf32>
    %153 = vector.broadcast %152 : vector<1x64xf32> to vector<8x64xf32>
    %154 = arith.addf %151, %153 : vector<8x64xf32>
    %c0_32 = arith.constant 0 : index
    %c0_33 = arith.constant 0 : index
    %155 = vector.load %arg14[%c0_32, %c0_33] : memref<6x64xf32, #tpu.memory_space<vmem>>, vector<6x64xf32>
    %c0_34 = arith.constant 0 : index
    %c0_35 = arith.constant 0 : index
    %156 = vector.load %arg15[%c0_34, %c0_35] : memref<4x64xf32, #tpu.memory_space<vmem>>, vector<4x64xf32>
    %157 = vector.extract_strided_slice %155 {offsets = [5, 0], sizes = [1, 64], strides = [1, 1]} : vector<6x64xf32> to vector<1x64xf32>
    %158 = vector.broadcast %157 : vector<1x64xf32> to vector<8x64xf32>
    %159 = arith.mulf %158, %154 : vector<8x64xf32>
    %160 = vector.extract_strided_slice %155 {offsets = [4, 0], sizes = [1, 64], strides = [1, 1]} : vector<6x64xf32> to vector<1x64xf32>
    %161 = vector.broadcast %160 : vector<1x64xf32> to vector<8x64xf32>
    %162 = arith.addf %159, %161 : vector<8x64xf32>
    %163 = arith.mulf %162, %154 : vector<8x64xf32>
    %164 = vector.extract_strided_slice %155 {offsets = [3, 0], sizes = [1, 64], strides = [1, 1]} : vector<6x64xf32> to vector<1x64xf32>
    %165 = vector.broadcast %164 : vector<1x64xf32> to vector<8x64xf32>
    %166 = arith.addf %163, %165 : vector<8x64xf32>
    %167 = arith.mulf %166, %154 : vector<8x64xf32>
    %168 = vector.extract_strided_slice %155 {offsets = [2, 0], sizes = [1, 64], strides = [1, 1]} : vector<6x64xf32> to vector<1x64xf32>
    %169 = vector.broadcast %168 : vector<1x64xf32> to vector<8x64xf32>
    %170 = arith.addf %167, %169 : vector<8x64xf32>
    %171 = arith.mulf %170, %154 : vector<8x64xf32>
    %172 = vector.extract_strided_slice %155 {offsets = [1, 0], sizes = [1, 64], strides = [1, 1]} : vector<6x64xf32> to vector<1x64xf32>
    %173 = vector.broadcast %172 : vector<1x64xf32> to vector<8x64xf32>
    %174 = arith.addf %171, %173 : vector<8x64xf32>
    %175 = arith.mulf %174, %154 : vector<8x64xf32>
    %176 = vector.extract_strided_slice %155 {offsets = [0, 0], sizes = [1, 64], strides = [1, 1]} : vector<6x64xf32> to vector<1x64xf32>
    %177 = vector.broadcast %176 : vector<1x64xf32> to vector<8x64xf32>
    %178 = arith.addf %175, %177 : vector<8x64xf32>
    %179 = vector.extract_strided_slice %156 {offsets = [3, 0], sizes = [1, 64], strides = [1, 1]} : vector<4x64xf32> to vector<1x64xf32>
    %180 = vector.broadcast %179 : vector<1x64xf32> to vector<8x64xf32>
    %181 = arith.mulf %180, %154 : vector<8x64xf32>
    %182 = vector.extract_strided_slice %156 {offsets = [2, 0], sizes = [1, 64], strides = [1, 1]} : vector<4x64xf32> to vector<1x64xf32>
    %183 = vector.broadcast %182 : vector<1x64xf32> to vector<8x64xf32>
    %184 = arith.addf %181, %183 : vector<8x64xf32>
    %185 = arith.mulf %184, %154 : vector<8x64xf32>
    %186 = vector.extract_strided_slice %156 {offsets = [1, 0], sizes = [1, 64], strides = [1, 1]} : vector<4x64xf32> to vector<1x64xf32>
    %187 = vector.broadcast %186 : vector<1x64xf32> to vector<8x64xf32>
    %188 = arith.addf %185, %187 : vector<8x64xf32>
    %189 = arith.mulf %188, %154 : vector<8x64xf32>
    %190 = vector.extract_strided_slice %156 {offsets = [0, 0], sizes = [1, 64], strides = [1, 1]} : vector<4x64xf32> to vector<1x64xf32>
    %191 = vector.broadcast %190 : vector<1x64xf32> to vector<8x64xf32>
    %192 = arith.addf %189, %191 : vector<8x64xf32>
    %193 = arith.mulf %192, %154 : vector<8x64xf32>
    %194 = math.absf %193 : vector<8x64xf32>
    %cst_36 = arith.constant 1.000000e+00 : f32
    %195 = vector.broadcast %cst_36 : f32 to vector<8x64xf32>
    %196 = arith.addf %195, %194 : vector<8x64xf32>
    %197 = tpu.reciprocal %196 {approx = true} : vector<8x64xf32> -> vector<8x64xf32>
    %198 = arith.mulf %178, %197 : vector<8x64xf32>
    %199 = arith.truncf %198 : vector<8x64xf32> to vector<8x64xbf16>
    %c0_37 = arith.constant 0 : index
    %c0_38 = arith.constant 0 : index
    %200 = vector.load %arg16[%c0_37, %c0_38] : memref<64x32xbf16, #tpu.memory_space<vmem>>, vector<64x32xbf16>
    %cst_39 = arith.constant dense<0.000000e+00> : vector<8x32xf32>
    %201 = tpu.matmul %199, %200, %cst_39 {dimension_numbers = #tpu.dot_dimension_numbers<[1], [0], [0], [1], [0, 0, 1, 1], [], []>} : vector<8x64xbf16>, vector<64x32xbf16>, vector<8x32xf32> -> vector<8x32xf32>
    %c0_40 = arith.constant 0 : index
    %c0_41 = arith.constant 0 : index
    %202 = vector.load %arg17[%c0_40, %c0_41] : memref<1x32xf32, #tpu.memory_space<vmem>>, vector<1x32xf32>
    %203 = vector.broadcast %202 : vector<1x32xf32> to vector<8x32xf32>
    %204 = arith.addf %201, %203 : vector<8x32xf32>
    %cst_42 = arith.constant 1.000000e+00 : f32
    %205 = vector.broadcast %cst_42 : f32 to vector<8x32xf32>
    %206 = arith.mulf %205, %104 : vector<8x32xf32>
    %207 = arith.addf %204, %206 : vector<8x32xf32>
    %c0_43 = arith.constant 0 : index
    %c0_44 = arith.constant 0 : index
    %c0_45 = arith.constant 0 : index
    %208 = vector.load %arg18[%c0_43, %c0_44, %c0_45] : memref<1x8x32xf32, #tpu.memory_space<vmem>>, vector<1x8x32xf32>
    %209 = vector.shape_cast %208 : vector<1x8x32xf32> to vector<8x32xf32>
    %210 = vector.shape_cast %207 : vector<8x32xf32> to vector<1x8x32xf32>
    tpu.vector_store %arg18[%c0_43, %c0_44, %c0_45], %210 {strides = array<i32>} : memref<1x8x32xf32, #tpu.memory_space<vmem>>, vector<1x8x32xf32>,
    return
  }
  func.func @transform_0(%arg0: i32) -> (i32, i32, i32) {
    %c0_i32 = arith.constant 0 : i32
    %c0_i32_0 = arith.constant 0 : i32
    %c0_i32_1 = arith.constant 0 : i32
    return %arg0, %c0_i32, %c0_i32_0 : i32, i32, i32
  }
  func.func @transform_1(%arg0: i32) -> (i32, i32) {
    %c0_i32 = arith.constant 0 : i32
    %c0_i32_0 = arith.constant 0 : i32
    %c0_i32_1 = arith.constant 0 : i32
    return %c0_i32, %c0_i32_0 : i32, i32
  }
  func.func @transform_2(%arg0: i32) -> (i32, i32) {
    %c0_i32 = arith.constant 0 : i32
    %c0_i32_0 = arith.constant 0 : i32
    %c0_i32_1 = arith.constant 0 : i32
    return %c0_i32, %c0_i32_0 : i32, i32
  }
  func.func @transform_3(%arg0: i32) -> (i32, i32) {
    %c0_i32 = arith.constant 0 : i32
    %c0_i32_0 = arith.constant 0 : i32
    %c0_i32_1 = arith.constant 0 : i32
    return %c0_i32, %c0_i32_0 : i32, i32
  }
  func.func @transform_4(%arg0: i32) -> (i32, i32) {
    %c0_i32 = arith.constant 0 : i32
    %c0_i32_0 = arith.constant 0 : i32
    %c0_i32_1 = arith.constant 0 : i32
    return %c0_i32, %c0_i32_0 : i32, i32
  }
  func.func @transform_5(%arg0: i32) -> (i32, i32) {
    %c0_i32 = arith.constant 0 : i32
    %c0_i32_0 = arith.constant 0 : i32
    %c0_i32_1 = arith.constant 0 : i32
    return %c0_i32, %c0_i32_0 : i32, i32
  }
  func.func @transform_6(%arg0: i32) -> (i32, i32) {
    %c0_i32 = arith.constant 0 : i32
    %c0_i32_0 = arith.constant 0 : i32
    %c0_i32_1 = arith.constant 0 : i32
    return %c0_i32, %c0_i32_0 : i32, i32
  }
  func.func @transform_7(%arg0: i32) -> (i32, i32) {
    %c0_i32 = arith.constant 0 : i32
    %c0_i32_0 = arith.constant 0 : i32
    %c0_i32_1 = arith.constant 0 : i32
    return %c0_i32, %c0_i32_0 : i32, i32
  }
  func.func @transform_8(%arg0: i32) -> (i32, i32) {
    %c0_i32 = arith.constant 0 : i32
    %c0_i32_0 = arith.constant 0 : i32
    %c0_i32_1 = arith.constant 0 : i32
    return %c0_i32, %c0_i32_0 : i32, i32
  }
  func.func @transform_9(%arg0: i32) -> (i32, i32) {
    %c0_i32 = arith.constant 0 : i32
    %c0_i32_0 = arith.constant 0 : i32
    %c0_i32_1 = arith.constant 0 : i32
    return %c0_i32, %c0_i32_0 : i32, i32
  }
  func.func @transform_10(%arg0: i32) -> (i32, i32) {
    %c0_i32 = arith.constant 0 : i32
    %c0_i32_0 = arith.constant 0 : i32
    %c0_i32_1 = arith.constant 0 : i32
    return %c0_i32, %c0_i32_0 : i32, i32
  }
  func.func @transform_11(%arg0: i32) -> (i32, i32) {
    %c0_i32 = arith.constant 0 : i32
    %c0_i32_0 = arith.constant 0 : i32
    %c0_i32_1 = arith.constant 0 : i32
    return %c0_i32, %c0_i32_0 : i32, i32
  }
  func.func @transform_12(%arg0: i32) -> (i32, i32) {
    %c0_i32 = arith.constant 0 : i32
    %c0_i32_0 = arith.constant 0 : i32
    %c0_i32_1 = arith.constant 0 : i32
    return %c0_i32, %c0_i32_0 : i32, i32
  }
  func.func @transform_13(%arg0: i32) -> (i32, i32) {
    %c0_i32 = arith.constant 0 : i32
    %c0_i32_0 = arith.constant 0 : i32
    %c0_i32_1 = arith.constant 0 : i32
    return %c0_i32, %c0_i32_0 : i32, i32
  }
  func.func @transform_14(%arg0: i32) -> (i32, i32) {
    %c0_i32 = arith.constant 0 : i32
    %c0_i32_0 = arith.constant 0 : i32
    %c0_i32_1 = arith.constant 0 : i32
    return %c0_i32, %c0_i32_0 : i32, i32
  }
  func.func @transform_15(%arg0: i32) -> (i32, i32) {
    %c0_i32 = arith.constant 0 : i32
    %c0_i32_0 = arith.constant 0 : i32
    %c0_i32_1 = arith.constant 0 : i32
    return %c0_i32, %c0_i32_0 : i32, i32
  }
  func.func @transform_16(%arg0: i32) -> (i32, i32) {
    %c0_i32 = arith.constant 0 : i32
    %c0_i32_0 = arith.constant 0 : i32
    %c0_i32_1 = arith.constant 0 : i32
    return %c0_i32, %c0_i32_0 : i32, i32
  }
  func.func @transform_17(%arg0: i32) -> (i32, i32, i32) {
    %c0_i32 = arith.constant 0 : i32
    %c0_i32_0 = arith.constant 0 : i32
    %c0_i32_1 = arith.constant 0 : i32
    return %arg0, %c0_i32, %c0_i32_0 : i32, i32, i32
  }
}

module attributes {stable_mosaic.version = 11 : i64} {
  func.func @_mixer_kernel(%arg0: i32, %arg1: memref<1x8x32xf32, #tpu.memory_space<vmem>>, %arg2: memref<8x6xf32, #tpu.memory_space<vmem>>, %arg3: memref<8x4xf32, #tpu.memory_space<vmem>>, %arg4: memref<16x8xbf16, #tpu.memory_space<vmem>>, %arg5: memref<16x1xf32, #tpu.memory_space<vmem>>, %arg6: memref<16x6xf32, #tpu.memory_space<vmem>>, %arg7: memref<16x4xf32, #tpu.memory_space<vmem>>, %arg8: memref<8x16xbf16, #tpu.memory_space<vmem>>, %arg9: memref<8x1xf32, #tpu.memory_space<vmem>>, %arg10: memref<6x32xf32, #tpu.memory_space<vmem>>, %arg11: memref<4x32xf32, #tpu.memory_space<vmem>>, %arg12: memref<32x64xbf16, #tpu.memory_space<vmem>>, %arg13: memref<1x64xf32, #tpu.memory_space<vmem>>, %arg14: memref<6x64xf32, #tpu.memory_space<vmem>>, %arg15: memref<4x64xf32, #tpu.memory_space<vmem>>, %arg16: memref<64x32xbf16, #tpu.memory_space<vmem>>, %arg17: memref<1x32xf32, #tpu.memory_space<vmem>>, %arg18: memref<1x8x32xf32, #tpu.memory_space<vmem>>) attributes {dimension_semantics = [#tpu.dimension_semantics<parallel>], iteration_bounds = array<i64: 2>, scalar_prefetch = 0 : i64, scratch_operands = 0 : i64, tpu.core_type = #tpu.core_type<tc>, window_params = [{transform_indices = @transform_0, window_bounds = array<i64: 1, 8, 32>}, {pipeline_mode = #tpu.pipeline_mode<synchronous>, transform_indices = @transform_1, window_bounds = array<i64: 8, 6>}, {pipeline_mode = #tpu.pipeline_mode<synchronous>, transform_indices = @transform_2, window_bounds = array<i64: 8, 4>}, {pipeline_mode = #tpu.pipeline_mode<synchronous>, transform_indices = @transform_3, window_bounds = array<i64: 16, 8>}, {pipeline_mode = #tpu.pipeline_mode<synchronous>, transform_indices = @transform_4, window_bounds = array<i64: 16, 1>}, {pipeline_mode = #tpu.pipeline_mode<synchronous>, transform_indices = @transform_5, window_bounds = array<i64: 16, 6>}, {pipeline_mode = #tpu.pipeline_mode<synchronous>, transform_indices = @transform_6, window_bounds = array<i64: 16, 4>}, {pipeline_mode = #tpu.pipeline_mode<synchronous>, transform_indices = @transform_7, window_bounds = array<i64: 8, 16>}, {pipeline_mode = #tpu.pipeline_mode<synchronous>, transform_indices = @transform_8, window_bounds = array<i64: 8, 1>}, {pipeline_mode = #tpu.pipeline_mode<synchronous>, transform_indices = @transform_9, window_bounds = array<i64: 6, 32>}, {pipeline_mode = #tpu.pipeline_mode<synchronous>, transform_indices = @transform_10, window_bounds = array<i64: 4, 32>}, {pipeline_mode = #tpu.pipeline_mode<synchronous>, transform_indices = @transform_11, window_bounds = array<i64: 32, 64>}, {pipeline_mode = #tpu.pipeline_mode<synchronous>, transform_indices = @transform_12, window_bounds = array<i64: 1, 64>}, {pipeline_mode = #tpu.pipeline_mode<synchronous>, transform_indices = @transform_13, window_bounds = array<i64: 6, 64>}, {pipeline_mode = #tpu.pipeline_mode<synchronous>, transform_indices = @transform_14, window_bounds = array<i64: 4, 64>}, {pipeline_mode = #tpu.pipeline_mode<synchronous>, transform_indices = @transform_15, window_bounds = array<i64: 64, 32>}, {pipeline_mode = #tpu.pipeline_mode<synchronous>, transform_indices = @transform_16, window_bounds = array<i64: 1, 32>}, {transform_indices = @transform_17, window_bounds = array<i64: 1, 8, 32>}]} {
    %c0 = arith.constant 0 : index
    %c0_0 = arith.constant 0 : index
    %c0_1 = arith.constant 0 : index
    %0 = vector.load %arg1[%c0, %c0_0, %c0_1] : memref<1x8x32xf32, #tpu.memory_space<vmem>>, vector<1x8x32xf32>
    %1 = vector.shape_cast %0 : vector<1x8x32xf32> to vector<8x32xf32>
    %c0_2 = arith.constant 0 : index
    %c0_3 = arith.constant 0 : index
    %2 = vector.load %arg2[%c0_2, %c0_3] : memref<8x6xf32, #tpu.memory_space<vmem>>, vector<8x6xf32>
    %c0_4 = arith.constant 0 : index
    %c0_5 = arith.constant 0 : index
    %3 = vector.load %arg3[%c0_4, %c0_5] : memref<8x4xf32, #tpu.memory_space<vmem>>, vector<8x4xf32>
    %4 = vector.extract_strided_slice %2 {offsets = [0, 5], sizes = [8, 1], strides = [1, 1]} : vector<8x6xf32> to vector<8x1xf32>
    %5 = vector.broadcast %4 : vector<8x1xf32> to vector<8x32xf32>
    %6 = arith.mulf %5, %1 : vector<8x32xf32>
    %7 = vector.extract_strided_slice %2 {offsets = [0, 4], sizes = [8, 1], strides = [1, 1]} : vector<8x6xf32> to vector<8x1xf32>
    %8 = vector.broadcast %7 : vector<8x1xf32> to vector<8x32xf32>
    %9 = arith.addf %6, %8 : vector<8x32xf32>
    %10 = arith.mulf %9, %1 : vector<8x32xf32>
    %11 = vector.extract_strided_slice %2 {offsets = [0, 3], sizes = [8, 1], strides = [1, 1]} : vector<8x6xf32> to vector<8x1xf32>
    %12 = vector.broadcast %11 : vector<8x1xf32> to vector<8x32xf32>
    %13 = arith.addf %10, %12 : vector<8x32xf32>
    %14 = arith.mulf %13, %1 : vector<8x32xf32>
    %15 = vector.extract_strided_slice %2 {offsets = [0, 2], sizes = [8, 1], strides = [1, 1]} : vector<8x6xf32> to vector<8x1xf32>
    %16 = vector.broadcast %15 : vector<8x1xf32> to vector<8x32xf32>
    %17 = arith.addf %14, %16 : vector<8x32xf32>
    %18 = arith.mulf %17, %1 : vector<8x32xf32>
    %19 = vector.extract_strided_slice %2 {offsets = [0, 1], sizes = [8, 1], strides = [1, 1]} : vector<8x6xf32> to vector<8x1xf32>
    %20 = vector.broadcast %19 : vector<8x1xf32> to vector<8x32xf32>
    %21 = arith.addf %18, %20 : vector<8x32xf32>
    %22 = arith.mulf %21, %1 : vector<8x32xf32>
    %23 = vector.extract_strided_slice %2 {offsets = [0, 0], sizes = [8, 1], strides = [1, 1]} : vector<8x6xf32> to vector<8x1xf32>
    %24 = vector.broadcast %23 : vector<8x1xf32> to vector<8x32xf32>
    %25 = arith.addf %22, %24 : vector<8x32xf32>
    %26 = vector.extract_strided_slice %3 {offsets = [0, 3], sizes = [8, 1], strides = [1, 1]} : vector<8x4xf32> to vector<8x1xf32>
    %27 = vector.broadcast %26 : vector<8x1xf32> to vector<8x32xf32>
    %28 = arith.mulf %27, %1 : vector<8x32xf32>
    %29 = vector.extract_strided_slice %3 {offsets = [0, 2], sizes = [8, 1], strides = [1, 1]} : vector<8x4xf32> to vector<8x1xf32>
    %30 = vector.broadcast %29 : vector<8x1xf32> to vector<8x32xf32>
    %31 = arith.addf %28, %30 : vector<8x32xf32>
    %32 = arith.mulf %31, %1 : vector<8x32xf32>
    %33 = vector.extract_strided_slice %3 {offsets = [0, 1], sizes = [8, 1], strides = [1, 1]} : vector<8x4xf32> to vector<8x1xf32>
    %34 = vector.broadcast %33 : vector<8x1xf32> to vector<8x32xf32>
    %35 = arith.addf %32, %34 : vector<8x32xf32>
    %36 = arith.mulf %35, %1 : vector<8x32xf32>
    %37 = vector.extract_strided_slice %3 {offsets = [0, 0], sizes = [8, 1], strides = [1, 1]} : vector<8x4xf32> to vector<8x1xf32>
    %38 = vector.broadcast %37 : vector<8x1xf32> to vector<8x32xf32>
    %39 = arith.addf %36, %38 : vector<8x32xf32>
    %40 = arith.mulf %39, %1 : vector<8x32xf32>
    %41 = math.absf %40 : vector<8x32xf32>
    %cst = arith.constant 1.000000e+00 : f32
    %42 = vector.broadcast %cst : f32 to vector<8x32xf32>
    %43 = arith.addf %42, %41 : vector<8x32xf32>
    %44 = tpu.reciprocal %43 {approx = true} : vector<8x32xf32> -> vector<8x32xf32>
    %45 = arith.mulf %25, %44 : vector<8x32xf32>
    %c0_6 = arith.constant 0 : index
    %c0_7 = arith.constant 0 : index
    %46 = vector.load %arg4[%c0_6, %c0_7] : memref<16x8xbf16, #tpu.memory_space<vmem>>, vector<16x8xbf16>
    %47 = arith.truncf %45 : vector<8x32xf32> to vector<8x32xbf16>
    %cst_8 = arith.constant dense<0.000000e+00> : vector<16x32xf32>
    %48 = tpu.matmul %46, %47, %cst_8 {dimension_numbers = #tpu.dot_dimension_numbers<[1], [0], [0], [1], [0, 0, 1, 1], [], []>} : vector<16x8xbf16>, vector<8x32xbf16>, vector<16x32xf32> -> vector<16x32xf32>
    %c0_9 = arith.constant 0 : index
    %c0_10 = arith.constant 0 : index
    %49 = vector.load %arg5[%c0_9, %c0_10] : memref<16x1xf32, #tpu.memory_space<vmem>>, vector<16x1xf32>
    %50 = vector.broadcast %49 : vector<16x1xf32> to vector<16x32xf32>
    %51 = arith.addf %48, %50 : vector<16x32xf32>
    %c0_11 = arith.constant 0 : index
    %c0_12 = arith.constant 0 : index
    %52 = vector.load %arg6[%c0_11, %c0_12] : memref<16x6xf32, #tpu.memory_space<vmem>>, vector<16x6xf32>
    %c0_13 = arith.constant 0 : index
    %c0_14 = arith.constant 0 : index
    %53 = vector.load %arg7[%c0_13, %c0_14] : memref<16x4xf32, #tpu.memory_space<vmem>>, vector<16x4xf32>
    %54 = vector.extract_strided_slice %52 {offsets = [0, 5], sizes = [16, 1], strides = [1, 1]} : vector<16x6xf32> to vector<16x1xf32>
    %55 = vector.broadcast %54 : vector<16x1xf32> to vector<16x32xf32>
    %56 = arith.mulf %55, %51 : vector<16x32xf32>
    %57 = vector.extract_strided_slice %52 {offsets = [0, 4], sizes = [16, 1], strides = [1, 1]} : vector<16x6xf32> to vector<16x1xf32>
    %58 = vector.broadcast %57 : vector<16x1xf32> to vector<16x32xf32>
    %59 = arith.addf %56, %58 : vector<16x32xf32>
    %60 = arith.mulf %59, %51 : vector<16x32xf32>
    %61 = vector.extract_strided_slice %52 {offsets = [0, 3], sizes = [16, 1], strides = [1, 1]} : vector<16x6xf32> to vector<16x1xf32>
    %62 = vector.broadcast %61 : vector<16x1xf32> to vector<16x32xf32>
    %63 = arith.addf %60, %62 : vector<16x32xf32>
    %64 = arith.mulf %63, %51 : vector<16x32xf32>
    %65 = vector.extract_strided_slice %52 {offsets = [0, 2], sizes = [16, 1], strides = [1, 1]} : vector<16x6xf32> to vector<16x1xf32>
    %66 = vector.broadcast %65 : vector<16x1xf32> to vector<16x32xf32>
    %67 = arith.addf %64, %66 : vector<16x32xf32>
    %68 = arith.mulf %67, %51 : vector<16x32xf32>
    %69 = vector.extract_strided_slice %52 {offsets = [0, 1], sizes = [16, 1], strides = [1, 1]} : vector<16x6xf32> to vector<16x1xf32>
    %70 = vector.broadcast %69 : vector<16x1xf32> to vector<16x32xf32>
    %71 = arith.addf %68, %70 : vector<16x32xf32>
    %72 = arith.mulf %71, %51 : vector<16x32xf32>
    %73 = vector.extract_strided_slice %52 {offsets = [0, 0], sizes = [16, 1], strides = [1, 1]} : vector<16x6xf32> to vector<16x1xf32>
    %74 = vector.broadcast %73 : vector<16x1xf32> to vector<16x32xf32>
    %75 = arith.addf %72, %74 : vector<16x32xf32>
    %76 = vector.extract_strided_slice %53 {offsets = [0, 3], sizes = [16, 1], strides = [1, 1]} : vector<16x4xf32> to vector<16x1xf32>
    %77 = vector.broadcast %76 : vector<16x1xf32> to vector<16x32xf32>
    %78 = arith.mulf %77, %51 : vector<16x32xf32>
    %79 = vector.extract_strided_slice %53 {offsets = [0, 2], sizes = [16, 1], strides = [1, 1]} : vector<16x4xf32> to vector<16x1xf32>
    %80 = vector.broadcast %79 : vector<16x1xf32> to vector<16x32xf32>
    %81 = arith.addf %78, %80 : vector<16x32xf32>
    %82 = arith.mulf %81, %51 : vector<16x32xf32>
    %83 = vector.extract_strided_slice %53 {offsets = [0, 1], sizes = [16, 1], strides = [1, 1]} : vector<16x4xf32> to vector<16x1xf32>
    %84 = vector.broadcast %83 : vector<16x1xf32> to vector<16x32xf32>
    %85 = arith.addf %82, %84 : vector<16x32xf32>
    %86 = arith.mulf %85, %51 : vector<16x32xf32>
    %87 = vector.extract_strided_slice %53 {offsets = [0, 0], sizes = [16, 1], strides = [1, 1]} : vector<16x4xf32> to vector<16x1xf32>
    %88 = vector.broadcast %87 : vector<16x1xf32> to vector<16x32xf32>
    %89 = arith.addf %86, %88 : vector<16x32xf32>
    %90 = arith.mulf %89, %51 : vector<16x32xf32>
    %91 = math.absf %90 : vector<16x32xf32>
    %cst_15 = arith.constant 1.000000e+00 : f32
    %92 = vector.broadcast %cst_15 : f32 to vector<16x32xf32>
    %93 = arith.addf %92, %91 : vector<16x32xf32>
    %94 = tpu.reciprocal %93 {approx = true} : vector<16x32xf32> -> vector<16x32xf32>
    %95 = arith.mulf %75, %94 : vector<16x32xf32>
    %c0_16 = arith.constant 0 : index
    %c0_17 = arith.constant 0 : index
    %96 = vector.load %arg8[%c0_16, %c0_17] : memref<8x16xbf16, #tpu.memory_space<vmem>>, vector<8x16xbf16>
    %97 = arith.truncf %95 : vector<16x32xf32> to vector<16x32xbf16>
    %cst_18 = arith.constant dense<0.000000e+00> : vector<8x32xf32>
    %98 = tpu.matmul %96, %97, %cst_18 {dimension_numbers = #tpu.dot_dimension_numbers<[1], [0], [0], [1], [0, 0, 1, 1], [], []>} : vector<8x16xbf16>, vector<16x32xbf16>, vector<8x32xf32> -> vector<8x32xf32>
    %c0_19 = arith.constant 0 : index
    %c0_20 = arith.constant 0 : index
    %99 = vector.load %arg9[%c0_19, %c0_20] : memref<8x1xf32, #tpu.memory_space<vmem>>, vector<8x1xf32>
    %100 = vector.broadcast %99 : vector<8x1xf32> to vector<8x32xf32>
    %101 = arith.addf %98, %100 : vector<8x32xf32>
    %cst_21 = arith.constant 1.000000e+00 : f32
    %102 = vector.broadcast %cst_21 : f32 to vector<8x32xf32>
    %103 = arith.mulf %102, %1 : vector<8x32xf32>
    %104 = arith.addf %101, %103 : vector<8x32xf32>
    %c0_22 = arith.constant 0 : index
    %c0_23 = arith.constant 0 : index
    %105 = vector.load %arg10[%c0_22, %c0_23] : memref<6x32xf32, #tpu.memory_space<vmem>>, vector<6x32xf32>
    %c0_24 = arith.constant 0 : index
    %c0_25 = arith.constant 0 : index
    %106 = vector.load %arg11[%c0_24, %c0_25] : memref<4x32xf32, #tpu.memory_space<vmem>>, vector<4x32xf32>
    %107 = vector.extract_strided_slice %105 {offsets = [5, 0], sizes = [1, 32], strides = [1, 1]} : vector<6x32xf32> to vector<1x32xf32>
    %108 = vector.broadcast %107 : vector<1x32xf32> to vector<8x32xf32>
    %109 = arith.mulf %108, %104 : vector<8x32xf32>
    %110 = vector.extract_strided_slice %105 {offsets = [4, 0], sizes = [1, 32], strides = [1, 1]} : vector<6x32xf32> to vector<1x32xf32>
    %111 = vector.broadcast %110 : vector<1x32xf32> to vector<8x32xf32>
    %112 = arith.addf %109, %111 : vector<8x32xf32>
    %113 = arith.mulf %112, %104 : vector<8x32xf32>
    %114 = vector.extract_strided_slice %105 {offsets = [3, 0], sizes = [1, 32], strides = [1, 1]} : vector<6x32xf32> to vector<1x32xf32>
    %115 = vector.broadcast %114 : vector<1x32xf32> to vector<8x32xf32>
    %116 = arith.addf %113, %115 : vector<8x32xf32>
    %117 = arith.mulf %116, %104 : vector<8x32xf32>
    %118 = vector.extract_strided_slice %105 {offsets = [2, 0], sizes = [1, 32], strides = [1, 1]} : vector<6x32xf32> to vector<1x32xf32>
    %119 = vector.broadcast %118 : vector<1x32xf32> to vector<8x32xf32>
    %120 = arith.addf %117, %119 : vector<8x32xf32>
    %121 = arith.mulf %120, %104 : vector<8x32xf32>
    %122 = vector.extract_strided_slice %105 {offsets = [1, 0], sizes = [1, 32], strides = [1, 1]} : vector<6x32xf32> to vector<1x32xf32>
    %123 = vector.broadcast %122 : vector<1x32xf32> to vector<8x32xf32>
    %124 = arith.addf %121, %123 : vector<8x32xf32>
    %125 = arith.mulf %124, %104 : vector<8x32xf32>
    %126 = vector.extract_strided_slice %105 {offsets = [0, 0], sizes = [1, 32], strides = [1, 1]} : vector<6x32xf32> to vector<1x32xf32>
    %127 = vector.broadcast %126 : vector<1x32xf32> to vector<8x32xf32>
    %128 = arith.addf %125, %127 : vector<8x32xf32>
    %129 = vector.extract_strided_slice %106 {offsets = [3, 0], sizes = [1, 32], strides = [1, 1]} : vector<4x32xf32> to vector<1x32xf32>
    %130 = vector.broadcast %129 : vector<1x32xf32> to vector<8x32xf32>
    %131 = arith.mulf %130, %104 : vector<8x32xf32>
    %132 = vector.extract_strided_slice %106 {offsets = [2, 0], sizes = [1, 32], strides = [1, 1]} : vector<4x32xf32> to vector<1x32xf32>
    %133 = vector.broadcast %132 : vector<1x32xf32> to vector<8x32xf32>
    %134 = arith.addf %131, %133 : vector<8x32xf32>
    %135 = arith.mulf %134, %104 : vector<8x32xf32>
    %136 = vector.extract_strided_slice %106 {offsets = [1, 0], sizes = [1, 32], strides = [1, 1]} : vector<4x32xf32> to vector<1x32xf32>
    %137 = vector.broadcast %136 : vector<1x32xf32> to vector<8x32xf32>
    %138 = arith.addf %135, %137 : vector<8x32xf32>
    %139 = arith.mulf %138, %104 : vector<8x32xf32>
    %140 = vector.extract_strided_slice %106 {offsets = [0, 0], sizes = [1, 32], strides = [1, 1]} : vector<4x32xf32> to vector<1x32xf32>
    %141 = vector.broadcast %140 : vector<1x32xf32> to vector<8x32xf32>
    %142 = arith.addf %139, %141 : vector<8x32xf32>
    %143 = arith.mulf %142, %104 : vector<8x32xf32>
    %144 = math.absf %143 : vector<8x32xf32>
    %cst_26 = arith.constant 1.000000e+00 : f32
    %145 = vector.broadcast %cst_26 : f32 to vector<8x32xf32>
    %146 = arith.addf %145, %144 : vector<8x32xf32>
    %147 = tpu.reciprocal %146 {approx = true} : vector<8x32xf32> -> vector<8x32xf32>
    %148 = arith.mulf %128, %147 : vector<8x32xf32>
    %149 = arith.truncf %148 : vector<8x32xf32> to vector<8x32xbf16>
    %c0_27 = arith.constant 0 : index
    %c0_28 = arith.constant 0 : index
    %150 = vector.load %arg12[%c0_27, %c0_28] : memref<32x64xbf16, #tpu.memory_space<vmem>>, vector<32x64xbf16>
    %cst_29 = arith.constant dense<0.000000e+00> : vector<8x64xf32>
    %151 = tpu.matmul %149, %150, %cst_29 {dimension_numbers = #tpu.dot_dimension_numbers<[1], [0], [0], [1], [0, 0, 1, 1], [], []>} : vector<8x32xbf16>, vector<32x64xbf16>, vector<8x64xf32> -> vector<8x64xf32>
    %c0_30 = arith.constant 0 : index
    %c0_31 = arith.constant 0 : index
    %152 = vector.load %arg13[%c0_30, %c0_31] : memref<1x64xf32, #tpu.memory_space<vmem>>, vector<1x64xf32>
    %153 = vector.broadcast %152 : vector<1x64xf32> to vector<8x64xf32>
    %154 = arith.addf %151, %153 : vector<8x64xf32>
    %c0_32 = arith.constant 0 : index
    %c0_33 = arith.constant 0 : index
    %155 = vector.load %arg14[%c0_32, %c0_33] : memref<6x64xf32, #tpu.memory_space<vmem>>, vector<6x64xf32>
    %c0_34 = arith.constant 0 : index
    %c0_35 = arith.constant 0 : index
    %156 = vector.load %arg15[%c0_34, %c0_35] : memref<4x64xf32, #tpu.memory_space<vmem>>, vector<4x64xf32>
    %157 = vector.extract_strided_slice %155 {offsets = [5, 0], sizes = [1, 64], strides = [1, 1]} : vector<6x64xf32> to vector<1x64xf32>
    %158 = vector.broadcast %157 : vector<1x64xf32> to vector<8x64xf32>
    %159 = arith.mulf %158, %154 : vector<8x64xf32>
    %160 = vector.extract_strided_slice %155 {offsets = [4, 0], sizes = [1, 64], strides = [1, 1]} : vector<6x64xf32> to vector<1x64xf32>
    %161 = vector.broadcast %160 : vector<1x64xf32> to vector<8x64xf32>
    %162 = arith.addf %159, %161 : vector<8x64xf32>
    %163 = arith.mulf %162, %154 : vector<8x64xf32>
    %164 = vector.extract_strided_slice %155 {offsets = [3, 0], sizes = [1, 64], strides = [1, 1]} : vector<6x64xf32> to vector<1x64xf32>
    %165 = vector.broadcast %164 : vector<1x64xf32> to vector<8x64xf32>
    %166 = arith.addf %163, %165 : vector<8x64xf32>
    %167 = arith.mulf %166, %154 : vector<8x64xf32>
    %168 = vector.extract_strided_slice %155 {offsets = [2, 0], sizes = [1, 64], strides = [1, 1]} : vector<6x64xf32> to vector<1x64xf32>
    %169 = vector.broadcast %168 : vector<1x64xf32> to vector<8x64xf32>
    %170 = arith.addf %167, %169 : vector<8x64xf32>
    %171 = arith.mulf %170, %154 : vector<8x64xf32>
    %172 = vector.extract_strided_slice %155 {offsets = [1, 0], sizes = [1, 64], strides = [1, 1]} : vector<6x64xf32> to vector<1x64xf32>
    %173 = vector.broadcast %172 : vector<1x64xf32> to vector<8x64xf32>
    %174 = arith.addf %171, %173 : vector<8x64xf32>
    %175 = arith.mulf %174, %154 : vector<8x64xf32>
    %176 = vector.extract_strided_slice %155 {offsets = [0, 0], sizes = [1, 64], strides = [1, 1]} : vector<6x64xf32> to vector<1x64xf32>
    %177 = vector.broadcast %176 : vector<1x64xf32> to vector<8x64xf32>
    %178 = arith.addf %175, %177 : vector<8x64xf32>
    %179 = vector.extract_strided_slice %156 {offsets = [3, 0], sizes = [1, 64], strides = [1, 1]} : vector<4x64xf32> to vector<1x64xf32>
    %180 = vector.broadcast %179 : vector<1x64xf32> to vector<8x64xf32>
    %181 = arith.mulf %180, %154 : vector<8x64xf32>
    %182 = vector.extract_strided_slice %156 {offsets = [2, 0], sizes = [1, 64], strides = [1, 1]} : vector<4x64xf32> to vector<1x64xf32>
    %183 = vector.broadcast %182 : vector<1x64xf32> to vector<8x64xf32>
    %184 = arith.addf %181, %183 : vector<8x64xf32>
    %185 = arith.mulf %184, %154 : vector<8x64xf32>
    %186 = vector.extract_strided_slice %156 {offsets = [1, 0], sizes = [1, 64], strides = [1, 1]} : vector<4x64xf32> to vector<1x64xf32>
    %187 = vector.broadcast %186 : vector<1x64xf32> to vector<8x64xf32>
    %188 = arith.addf %185, %187 : vector<8x64xf32>
    %189 = arith.mulf %188, %154 : vector<8x64xf32>
    %190 = vector.extract_strided_slice %156 {offsets = [0, 0], sizes = [1, 64], strides = [1, 1]} : vector<4x64xf32> to vector<1x64xf32>
    %191 = vector.broadcast %190 : vector<1x64xf32> to vector<8x64xf32>
    %192 = arith.addf %189, %191 : vector<8x64xf32>
    %193 = arith.mulf %192, %154 : vector<8x64xf32>
    %194 = math.absf %193 : vector<8x64xf32>
    %cst_36 = arith.constant 1.000000e+00 : f32
    %195 = vector.broadcast %cst_36 : f32 to vector<8x64xf32>
    %196 = arith.addf %195, %194 : vector<8x64xf32>
    %197 = tpu.reciprocal %196 {approx = true} : vector<8x64xf32> -> vector<8x64xf32>
    %198 = arith.mulf %178, %197 : vector<8x64xf32>
    %199 = arith.truncf %198 : vector<8x64xf32> to vector<8x64xbf16>
    %c0_37 = arith.constant 0 : index
    %c0_38 = arith.constant 0 : index
    %200 = vector.load %arg16[%c0_37, %c0_38] : memref<64x32xbf16, #tpu.memory_space<vmem>>, vector<64x32xbf16>
    %cst_39 = arith.constant dense<0.000000e+00> : vector<8x32xf32>
    %201 = tpu.matmul %199, %200, %cst_39 {dimension_numbers = #tpu.dot_dimension_numbers<[1], [0], [0], [1], [0, 0, 1, 1], [], []>} : vector<8x64xbf16>, vector<64x32xbf16>, vector<8x32xf32> -> vector<8x32xf32>
    %c0_40 = arith.constant 0 : index
    %c0_41 = arith.constant 0 : index
    %202 = vector.load %arg17[%c0_40, %c0_41] : memref<1x32xf32, #tpu.memory_space<vmem>>, vector<1x32xf32>
    %203 = vector.broadcast %202 : vector<1x32xf32> to vector<8x32xf32>
    %204 = arith.addf %201, %203 : vector<8x32xf32>
    %cst_42 = arith.constant 1.000000e+00 : f32
    %205 = vector.broadcast %cst_42 : f32 to vector<8x32xf32>
    %206 = arith.mulf %205, %104 : vector<8x32xf32>
    %207 = arith.addf %204, %206 : vector<8x32xf32>
    %c0_43 = arith.constant 0 : index
    %c0_44 = arith.constant 0 : index
    %c0_45 = arith.constant 0 : index
    %208 = vector.load %arg18[%c0_43, %c0_44, %c0_45] : memref<1x8x32xf32, #tpu.memory_space<vmem>>, vector<1x8x32xf32>
    %209 = vector.shape_cast %208 : vector<1x8x32xf32> to vector<8x32xf32>
    %210 = vector.shape_cast %207 : vector<8x32xf32> to vector<1x8x32xf32>
    tpu.vector_store %arg18[%c0_43, %c0_44, %c0_45], %210 {strides = array<i32>} : memref<1x8x32xf32, #tpu.memory_space<vmem>>, vector<1x8x32xf32>,
    return
  }
  func.func @transform_0(%arg0: i32) -> (i32, i32, i32) {
    %c0_i32 = arith.constant 0 : i32
    %c0_i32_0 = arith.constant 0 : i32
    %c0_i32_1 = arith.constant 0 : i32
    return %arg0, %c0_i32, %c0_i32_0 : i32, i32, i32
  }
  func.func @transform_1(%arg0: i32) -> (i32, i32) {
    %c0_i32 = arith.constant 0 : i32
    %c0_i32_0 = arith.constant 0 : i32
    %c0_i32_1 = arith.constant 0 : i32
    return %c0_i32, %c0_i32_0 : i32, i32
  }
  func.func @transform_2(%arg0: i32) -> (i32, i32) {
    %c0_i32 = arith.constant 0 : i32
    %c0_i32_0 = arith.constant 0 : i32
    %c0_i32_1 = arith.constant 0 : i32
    return %c0_i32, %c0_i32_0 : i32, i32
  }
  func.func @transform_3(%arg0: i32) -> (i32, i32) {
    %c0_i32 = arith.constant 0 : i32
    %c0_i32_0 = arith.constant 0 : i32
    %c0_i32_1 = arith.constant 0 : i32
    return %c0_i32, %c0_i32_0 : i32, i32
  }
  func.func @transform_4(%arg0: i32) -> (i32, i32) {
    %c0_i32 = arith.constant 0 : i32
    %c0_i32_0 = arith.constant 0 : i32
    %c0_i32_1 = arith.constant 0 : i32
    return %c0_i32, %c0_i32_0 : i32, i32
  }
  func.func @transform_5(%arg0: i32) -> (i32, i32) {
    %c0_i32 = arith.constant 0 : i32
    %c0_i32_0 = arith.constant 0 : i32
    %c0_i32_1 = arith.constant 0 : i32
    return %c0_i32, %c0_i32_0 : i32, i32
  }
  func.func @transform_6(%arg0: i32) -> (i32, i32) {
    %c0_i32 = arith.constant 0 : i32
    %c0_i32_0 = arith.constant 0 : i32
    %c0_i32_1 = arith.constant 0 : i32
    return %c0_i32, %c0_i32_0 : i32, i32
  }
  func.func @transform_7(%arg0: i32) -> (i32, i32) {
    %c0_i32 = arith.constant 0 : i32
    %c0_i32_0 = arith.constant 0 : i32
    %c0_i32_1 = arith.constant 0 : i32
    return %c0_i32, %c0_i32_0 : i32, i32
  }
  func.func @transform_8(%arg0: i32) -> (i32, i32) {
    %c0_i32 = arith.constant 0 : i32
    %c0_i32_0 = arith.constant 0 : i32
    %c0_i32_1 = arith.constant 0 : i32
    return %c0_i32, %c0_i32_0 : i32, i32
  }
  func.func @transform_9(%arg0: i32) -> (i32, i32) {
    %c0_i32 = arith.constant 0 : i32
    %c0_i32_0 = arith.constant 0 : i32
    %c0_i32_1 = arith.constant 0 : i32
    return %c0_i32, %c0_i32_0 : i32, i32
  }
  func.func @transform_10(%arg0: i32) -> (i32, i32) {
    %c0_i32 = arith.constant 0 : i32
    %c0_i32_0 = arith.constant 0 : i32
    %c0_i32_1 = arith.constant 0 : i32
    return %c0_i32, %c0_i32_0 : i32, i32
  }
  func.func @transform_11(%arg0: i32) -> (i32, i32) {
    %c0_i32 = arith.constant 0 : i32
    %c0_i32_0 = arith.constant 0 : i32
    %c0_i32_1 = arith.constant 0 : i32
    return %c0_i32, %c0_i32_0 : i32, i32
  }
  func.func @transform_12(%arg0: i32) -> (i32, i32) {
    %c0_i32 = arith.constant 0 : i32
    %c0_i32_0 = arith.constant 0 : i32
    %c0_i32_1 = arith.constant 0 : i32
    return %c0_i32, %c0_i32_0 : i32, i32
  }
  func.func @transform_13(%arg0: i32) -> (i32, i32) {
    %c0_i32 = arith.constant 0 : i32
    %c0_i32_0 = arith.constant 0 : i32
    %c0_i32_1 = arith.constant 0 : i32
    return %c0_i32, %c0_i32_0 : i32, i32
  }
  func.func @transform_14(%arg0: i32) -> (i32, i32) {
    %c0_i32 = arith.constant 0 : i32
    %c0_i32_0 = arith.constant 0 : i32
    %c0_i32_1 = arith.constant 0 : i32
    return %c0_i32, %c0_i32_0 : i32, i32
  }
  func.func @transform_15(%arg0: i32) -> (i32, i32) {
    %c0_i32 = arith.constant 0 : i32
    %c0_i32_0 = arith.constant 0 : i32
    %c0_i32_1 = arith.constant 0 : i32
    return %c0_i32, %c0_i32_0 : i32, i32
  }
  func.func @transform_16(%arg0: i32) -> (i32, i32) {
    %c0_i32 = arith.constant 0 : i32
    %c0_i32_0 = arith.constant 0 : i32
    %c0_i32_1 = arith.constant 0 : i32
    return %c0_i32, %c0_i32_0 : i32, i32
  }
  func.func @transform_17(%arg0: i32) -> (i32, i32, i32) {
    %c0_i32 = arith.constant 0 : i32
    %c0_i32_0 = arith.constant 0 : i32
    %c0_i32_1 = arith.constant 0 : i32
    return %arg0, %c0_i32, %c0_i32_0 : i32, i32, i32
  }
}

</mosaic_0001>

<bundles_post_ra>
// kernel: tpu_custom_call.1
= control target key start
LH: loop header
LB: loop body
LE: loop exit
PB: predicated region body
PF: predicated region fallthrough
CT: control target
= control target key end

     0   :  { %s1808_s0 = inlined_call_operand.vmem [shape: f32[2,8,32], index: 0, kind: input, shape index: {}]   ;;  %s1809_s1 = inlined_call_operand.vmem [shape: f32[8,6], index: 1, kind: input, shape index: {}]   ;;  %s1810_s2 = inlined_call_operand.vmem [shape: f32[8,4], index: 2, kind: input, shape index: {}]   ;;  %s1811_s3 = inlined_call_operand.vmem [shape: bf16[16,8], index: 3, kind: input, shape index: {}]   ;;  %s1812_s4 = inlined_call_operand.vmem [shape: f32[16,1], index: 4, kind: input, shape index: {}]   ;;  %s1813_s5 = inlined_call_operand.vmem [shape: f32[16,6], index: 5, kind: input, shape index: {}]   ;;  %s1814_s6 = inlined_call_operand.vmem [shape: f32[16,4], index: 6, kind: input, shape index: {}]   ;;  %s1815_s7 = inlined_call_operand.vmem [shape: bf16[8,16], index: 7, kind: input, shape index: {}]   ;;  %s1816_s8 = inlined_call_operand.vmem [shape: f32[8,1], index: 8, kind: input, shape index: {}]   ;;  %s1817_s9 = inlined_call_operand.vmem [shape: f32[6,32], index: 9, kind: input, shape index: {}]   ;;  %s1818_s10 = inlined_call_operand.vmem [shape: f32[4,32], index: 10, kind: input, shape index: {}]   ;;  %s1819_s11 = inlined_call_operand.vmem [shape: bf16[32,64], index: 11, kind: input, shape index: {}]   ;;  %s1820_s12 = inlined_call_operand.vmem [shape: f32[1,64], index: 12, kind: input, shape index: {}]   ;;  %s1821_s13 = inlined_call_operand.vmem [shape: f32[6,64], index: 13, kind: input, shape index: {}]   ;;  %s1822_s14 = inlined_call_operand.vmem [shape: f32[4,64], index: 14, kind: input, shape index: {}]   ;;  %s1823_s15 = inlined_call_operand.vmem [shape: bf16[64,32], index: 15, kind: input, shape index: {}]   ;;  %s1824_s16 = inlined_call_operand.vmem [shape: f32[1,32], index: 16, kind: input, shape index: {}]   ;;  %s1825_s17 = inlined_call_operand.hbm [shape: f32[2,8,32], index: 17, kind: output, shape index: {}]  }
   0x1   :  { %1826 = sst [smem:[#allocation5_spill]] %s1808_s0 }
   0x2   :  { %1827 = sst [smem:[#allocation6_spill]] %s1809_s1 }
   0x3   :  { %1828 = sst [smem:[#allocation7_spill]] %s1810_s2 }
   0x4   :  { %1829 = sst [smem:[#allocation8_spill]] %s1811_s3 }
   0x5   :  { %1830 = sst [smem:[#allocation9_spill]] %s1812_s4 }
   0x6   :  { %1831 = sst [smem:[#allocation10_spill]] %s1813_s5 }
   0x7   :  { %1832 = sst [smem:[#allocation11_spill]] %s1814_s6 }
   0x8   :  { %22 = vsyncpa [#allocation3], 0 }
   0x9   :  { %24 = vsyncpa [#allocation3 + $0x1], 0  ;;  %s1536_s24 = smov 0   ;;  %s1538_s25 = smov 0  }
   0xa   :  { %s1540_s26 = smov 0   ;;  %s1542_s27 = smov 0  }
   0xb LB: > { %s1557_s28 = sadd.s32 4294967295, %s1435_s27   ;;  %s1216_s29 = sadd.s32 4294967294, %s1435_s27   ;;  %s1435_s27 = sphi %s1542_s27, %s1845_s27   ;;  %s1431_s26 = sphi %s1540_s26, %s1844_s26   ;;  %s1427_s25 = sphi %s1538_s25, %s1843_s25   ;;  %s1423_s24 = sphi %s1536_s24, %s1842_s24  }
   0xc   : > { %s1561_s0 = sadd.s32 1, %s1435_s27   ;;  %s399_s30 = sadd.s32 1, %s1431_s26 }
   0xd   : > { %s396_s18 = ssub.s32 %s1435_s27, %s1561_s0  ;;  %p409_p0 = scmp.ne.s32.totalorder %s1431_s26, %s1427_s25 }
   0xe   : > { %p397_p1 = scmp.eq.s32.totalorder %s396_s18, 0  ;;  %p410_p2 = scmp.eq.s32.totalorder %s1557_s28, 1 }
   0xf   : > { %p415_p3 = scmp.ne.s32.totalorder %s1427_s25, %s1423_s24  ;;  %p416_p4 = scmp.eq.s32.totalorder %s1216_s29, 1 }
  0x10   : > { %s1572_s19 = scalar_select %p397_p1, %s1431_s26, %s399_s30  }
  0x11   : > { %p1574_p5 = por %p410_p2, %p409_p0  ;;  %p1578_p6 = por %p416_p4, %p415_p3 }
  0x12   : > { %p1219_p7 = scmp.ge.s32.totalorder %s1435_s27, 1  ;;  %p489_p8 = scmp.lt.s32.totalorder %s1435_s27, 3 }
  0x14   : > { %p490_p9 = pnand %p1219_p7, %p489_p8 }
  0x15   : > { %s1835_s2 = sld [smem:[#allocation7_spill]] (!%p490_p9)  ;;  %p540_p10 = scmp.lt.s32.totalorder (!%p490_p9), %s1557_s28, 1 }
  0x16   : > { %493 = sbr.rel (%p490_p9) target bundleno = 1109 (0x455), region = 88  ;;  %s1836_s30 = sld [smem:[#allocation6_spill]] (!%p490_p9) }
  0x17   : > { %s1837_s4 = sld [smem:[#allocation9_spill]] (!%p490_p9)  ;;  %s1445_s22 = smov (!%p490_p9), [#allocation2]  }
  0x18   : > { %s1838_s6 = sld [smem:[#allocation11_spill]] (!%p490_p9)  ;;  %s1379_s23 = sshll.u32 (!%p490_p9), %s1445_s22, 4  ;;  %s1380_s23 = int_to_ptr.vmem [resolvable:$false] %s1379_s23 }
  0x19   : > { %s1839_s5 = sld [smem:[#allocation10_spill]] (!%p490_p9) }
  0x1a   : > { %s1840_s29 = sld [smem:[#allocation5_spill]] (!%p490_p9) }
  0x1b   : > { %v547_v0 = vld [vmem:[%s1835_s2] sm:$0xff]  ;;  %v1437_v1 = vmov 3   ;;  %v1438_v2 = vmov 1   ;;  %v1439_v3 = vmov 2   ;;  %v1440_v4 = vmov 0   ;;  %s541_s18 = scalar_select %p540_p10, %s1557_s28, 1 }
  0x1c   : > { %1330 = vset.pattern.permute.xlu0 %v1437_v1  ;;  %1332 = vset.pattern.permute.xlu1 %v1438_v2  ;;  %v546_v5 = vld [vmem:[%s1836_s30] sm:$0xff]  ;;  %v1441_v6 = vmov 5   ;;  %v1442_v7 = vmov 4   ;;  %v1443_v9 = vmov 0.0   ;;  %vm1444_vm0 = vmmov 0   ;;  %s1841_s3 = sld [smem:[#allocation8_spill]] }
  0x1d   : > { %585 = vperm.xlu0 %1330, %v547_v0   ;;  %596 = vperm.xlu1 %1332, %v547_v0   ;;  %v614_v8 = vld [vmem:[%s1837_s4] sm:$0xff]  ;;  %v615_v11 = vld [vmem:[%s1837_s4 + $0x8] sm:$0xff]  ;;  %s1221_s21 = sshll.u32 %s541_s18, 3  ;;  %vm635_vm1 = vcmask 1043456   ;;  %vm631_vm2 = vcmask 64512   ;;  %vm818_vm3 = vcmask 130048  }
  0x1e   : > { %1251 = vmatprep.subr.bf16.mxu0 %v1443_v9  ;;  %1257 = vmatprep.subr.bf16.mxu1 %v1443_v9  ;;  %v682_v10 = vld [vmem:[%s1838_s6] sm:$0xff]  ;;  %v683_v12 = vld [vmem:[%s1838_s6 + $0x8] sm:$0xff]  ;;  %vm950_vm4 = vcmask 261120   ;;  %vm1097_vm5 = vcmask 523264   ;;  %s537_s2 = sand.u32 1, %s1427_s25   ;;  %s1381_s4 = scalar_lea.vmem %s1380_s23, 256 }
  0x1f   : > { %1253 = vmatprep.mubr.msk.bf16.mxu0 %vm1444_vm0, %v1443_v9  ;;  %1259 = vmatprep.mubr.msk.bf16.mxu1 %vm1444_vm0, %v1443_v9  ;;  %v680_v13 = vld [vmem:[%s1839_s5] sm:$0xff]  ;;  %v681_v14 = vld [vmem:[%s1839_s5 + $0x8] sm:$0xff] }
  0x20   : > { %s543_s30 = scalar_lea.vmem %s1840_s29, %s1221_s21  ;;  %v812_v50 = vld [vmem:[%s1816_s8] sm:$0xff]  ;;  %s1236_s29 = sshll.u32 %s1557_s28, 7 }
  0x21   : > { %1331 = vset.pattern.permute.xlu0 %v1439_v3  ;;  %1333 = vset.pattern.permute.xlu1 %v1440_v4  ;;  %v1641_v17 = vld [vmem:[%s543_s30] sm:$0xff]  ;;  %s1766_s5 = scalar_lea.hbm %s1825_s17, %s1236_s29  ;;  %s1144_s28 = scalar_lea.sflag [#allocation3], %s537_s2 }
  0x22   : > { %590 = vperm.xlu0 %1331, %v547_v0   ;;  %602 = vperm.xlu1 %1333, %v547_v0   ;;  %v1358_v49 = vld [vmem:[%s1841_s3] sm:$0xff]   ;;  %s1220_s3 = sshll.u32 %s537_s2, 3 }
  0x23   : > { %s539_s30 = scalar_lea.vmem [#allocation2], %s1220_s3 }
  0x24   : > { %s1157_s18 = sshll.u32 %s539_s30, 4  ;;  %s1768_s18 = int_to_ptr.vmem [resolvable:$true] %s1157_s18 }
  0x25   : > { %s1375_s3 = scalar_lea.vmem %s1768_s18, 128  ;;  %p1382_p0 = scmp.lt.s32.totalorder %s1768_s18, %s1380_s23 }
  0x26   : > { %1334 = vset.pattern.permute.xlu1 %v1441_v6  ;;  %1335 = vset.pattern.permute.xlu0 %v1442_v7  ;;  %p1376_p11 = scmp.ne.s32.totalorder %s1768_s18, %s1375_s3  ;;  %p1383_p1 = scmp.lt.s32.totalorder %s1381_s4, %s1375_s3 }
  0x27   : > { %550 = vperm.xlu1 %1334, %v546_v5   ;;  %555 = vperm.xlu0 %1335, %v546_v5  }
  0x28   : > { %p1377_p12 = pnand %p1376_p11, %p1574_p5  ;;  %p1384_p2 = por %p1383_p1, %p1382_p0 }
  0x2a   : > { %p1378_p13 = pneg %p1377_p12 }
  0x2b   : > { %1336 = vset.pattern.permute.xlu1 %v1437_v1  ;;  %1338 = vset.pattern.permute.xlu0 %v1438_v2 }
  0x2c   : > { %561 = vperm.xlu1 %1336, %v546_v5   ;;  %573 = vperm.xlu0 %1338, %v546_v5   ;;  %p1385_p3 = pnand %p1384_p2, %p1378_p13 }
  0x30   : > { %1337 = vset.pattern.permute.xlu1 %v1439_v3  ;;  %1340 = vset.pattern.permute.xlu0 %v1440_v4 }
  0x31   : > { %567 = vperm.xlu1 %1337, %v546_v5   ;;  %623 = vperm.xlu0 %1340, %v615_v11  }
  0x35   : > { %1339 = vset.pattern.permute.xlu1 %v1440_v4  ;;  %1342 = vset.pattern.permute.xlu0 %v1439_v3 }
  0x36   : > { %579 = vperm.xlu1 %1339, %v546_v5   ;;  %767 = vperm.xlu0 %1342, %v682_v10  }
  0x3a   : > { %618 = vperm.xlu1 %1339, %v614_v8   ;;  %1345 = vset.pattern.permute.xlu0 %v1438_v2 }
  0x3b   : > { %783 = vperm.xlu0 %1345, %v683_v12  }
  0x3e   : > { %1341 = vset.pattern.permute.xlu1 %v1437_v1 }
  0x3f   : > { %756 = vperm.xlu1 %1341, %v682_v10   ;;  %1347 = vset.pattern.permute.xlu0 %v1441_v6 }
  0x40   : > { %686 = vperm.xlu0 %1347, %v680_v13  }
  0x43   : > { %761 = vperm.xlu1 %1341, %v683_v12  }
  0x44   : > { %1350 = vset.pattern.permute.xlu0 %v1442_v7 }
  0x45   : > { %701 = vperm.xlu0 %1350, %v681_v14  }
  0x47   : > { %1343 = vset.pattern.permute.xlu1 %v1439_v3 }
  0x48   : > { %771 = vperm.xlu1 %1343, %v683_v12  }
  0x49   : > { %1352 = vset.pattern.permute.xlu0 %v1439_v3 }
  0x4a   : > { %721 = vperm.xlu0 %1352, %v680_v13  }
  0x4c   : > { %1344 = vset.pattern.permute.xlu1 %v1438_v2 }
  0x4d   : > { %779 = vperm.xlu1 %1344, %v682_v10  }
  0x4e   : > { %1355 = vset.pattern.permute.xlu0 %v1438_v2 }
  0x4f   : > { %737 = vperm.xlu0 %1355, %v681_v14  }
  0x51   : > { %1346 = vset.pattern.permute.xlu1 %v1440_v4 }
  0x52   : > { %791 = vperm.xlu1 %1346, %v682_v10  }
  0x53   : > { %1357 = vset.pattern.permute.xlu0 %v1440_v4 }
  0x54   : > { %815 = vperm.xlu0 %1357, %v812_v50  }
  0x56   : > { %795 = vperm.xlu1 %1346, %v683_v12  }
  0x5a   : > { %1348 = vset.pattern.permute.xlu1 %v1441_v6 }
  0x5b   : > { %691 = vperm.xlu1 %1348, %v681_v14  }
  0x5f   : > { %1349 = vset.pattern.permute.xlu1 %v1442_v7 }
  0x60   : > { %697 = vperm.xlu1 %1349, %v680_v13  }
  0x64   : > { %1351 = vset.pattern.permute.xlu1 %v1437_v1 }
  0x65   : > { %709 = vperm.xlu1 %1351, %v680_v13  }
  0x69   : > { %713 = vperm.xlu1 %1351, %v681_v14  }
  0x6d   : > { %1353 = vset.pattern.permute.xlu1 %v1439_v3 }
  0x6e   : > { %725 = vperm.xlu1 %1353, %v681_v14  }
  0x72   : > { %1354 = vset.pattern.permute.xlu1 %v1438_v2 }
  0x73   : > { %733 = vperm.xlu1 %1354, %v680_v13  }
  0x77   : > { %1356 = vset.pattern.permute.xlu1 %v1440_v4 }
  0x78   : > { %745 = vperm.xlu1 %1356, %v680_v13  }
  0x7c   : > { %749 = vperm.xlu1 %1356, %v681_v14  }
  0x98   : > { %v586_v15 = vpop.permute.xlu0 %585  ;;  %v597_v16 = vpop.permute.xlu1 %596 }
  0x99   : > { %v588_v18 = vmul.f32 %v586_v15, %v1641_v17 }
  0x9d   : > { %v591_v19 = vpop.permute.xlu0 %590  ;;  %v603_v20 = vpop.permute.xlu1 %602 }
  0x9e   : > { %v593_v21 = vadd.f32 %v591_v19, %v588_v18 }
  0xa0   : > { %v594_v22 = vmul.f32 %v593_v21, %v1641_v17 }
  0xa2   : > { %v599_v23 = vadd.f32 %v597_v16, %v594_v22  ;;  %v551_v24 = vpop.permute.xlu1 %550  ;;  %v556_v25 = vpop.permute.xlu0 %555 }
  0xa3   : > { %v553_v26 = vmul.f32 %v551_v24, %v1641_v17 }
  0xa4   : > { %v600_v27 = vmul.f32 %v599_v23, %v1641_v17 }
  0xa5   : > { %v558_v28 = vadd.f32 %v556_v25, %v553_v26 }
  0xa6   : > { %v605_v29 = vadd.f32 %v603_v20, %v600_v27 }
  0xa7   : > { %v562_v30 = vpop.permute.xlu1 %561  ;;  %v559_v31 = vmul.f32 %v558_v28, %v1641_v17  ;;  %v574_v39 = vpop.permute.xlu0 %573 }
  0xa8   : > { %v606_v32 = vmul.f32 %v605_v29, %v1641_v17 }
  0xa9   : > { %v564_v33 = vadd.f32 %v562_v30, %v559_v31 }
  0xaa   : > { %v607_v34 = vand.u32 2147483647, %v606_v32 }
  0xab   : > { %v565_v35 = vmul.f32 %v564_v33, %v1641_v17 }
  0xac   : > { %v608_v36 = vadd.f32 1.0, %v607_v34  ;;  %v568_v37 = vpop.permute.xlu1 %567  ;;  %v624_v57 = vpop.permute.xlu0 %623 }
  0xad   : > { %v570_v38 = vadd.f32 %v568_v37, %v565_v35 }
  0xae   : > { %1365 = vrcp.f32 %v608_v36 }
  0xaf   : > { %v571_v40 = vmul.f32 %v570_v38, %v1641_v17 }
  0xb1   : > { %v576_v41 = vadd.f32 %v574_v39, %v571_v40  ;;  %v580_v43 = vpop.permute.xlu1 %579  ;;  %v768_v59 = vpop.permute.xlu0 %767 }
  0xb3   : > { %v577_v42 = vmul.f32 %v576_v41, %v1641_v17 }
  0xb5   : > { %v582_v44 = vadd.f32 %v580_v43, %v577_v42  ;;  %v619_v51 = vpop.permute.xlu1 %618 }
  0xb6   : > { %v784_v61 = vpop.permute.xlu0 %783 }
  0xba   : > { %v757_v52 = vpop.permute.xlu1 %756 }
  0xbb   : > { %v1366_v45 = vpop.eup %1365  ;;  %v687_v0 = vpop.permute.xlu0 %686 }
  0xbc   : > { %v610_v46 = vmul.f32 %v1366_v45, %v582_v44 }
  0xbe   : > { %v613_v47 = vpack.c.bf16 %v610_v46, %v610_v46  ;;  %v762_v53 = vpop.permute.xlu1 %761 }
  0xc0   : > { %v637_v48 = vsel %vm635_vm1, %v613_v47, 0  ;;  %v702_v12 = vpop.permute.xlu0 %701 }
  0xc1   : > { %1252 = vmatpush3.bf16.msra.mxu0 %v637_v48 }
  0xc2   : > { %1263 = vmatprep.subr.bf16.mxu0 %v1443_v9 }
  0xc3   : > { %v772_v54 = vpop.permute.xlu1 %771 }
  0xc4   : > { %1254 = vmatmul.mubr.msk.bf16.vlgmr.msra.gmra.mxu0 %vm631_vm2, %v1358_v49 }
  0xc5   : > { %1267 = vmatprep.mubr.msk.bf16.mxu0 %vm1444_vm0, %v1443_v9  ;;  %v722_v36 = vpop.permute.xlu0 %721 }
  0xc8   : > { %v780_v55 = vpop.permute.xlu1 %779 }
  0xca   : > { %v738_v46 = vpop.permute.xlu0 %737 }
  0xcd   : > { %v792_v56 = vpop.permute.xlu1 %791 }
  0xd1   : > { %v796_v58 = vpop.permute.xlu1 %795 }
  0xd6   : > { %v692_v60 = vpop.permute.xlu1 %691 }
  0xdb   : > { %v698_v62 = vpop.permute.xlu1 %697 }
  0xe0   : > { %v710_v5 = vpop.permute.xlu1 %709 }
  0xe4   : > { %v714_v21 = vpop.permute.xlu1 %713 }
  0xe9   : > { %v726_v31 = vpop.permute.xlu1 %725 }
  0xee   : > { %v734_v42 = vpop.permute.xlu1 %733 }
  0xf3   : > { %v746_v47 = vpop.permute.xlu1 %745 }
 0x184   : > { %v673_v63 = vpop.f32.mrf.mxu0 }
 0x185   : > { %v674_v1 = vadd.f32 %v673_v63, %v619_v51  ;;  %v865_v63 = vlaneseq }
 0x186   : > { %v1255_v2 = vpop.f32.mrf.mxu0 }
 0x187   : > { %v694_v3 = vmul.f32 %v687_v0, %v674_v1  ;;  %v764_v4 = vmul.f32 %v757_v52, %v674_v1  ;;  %v750_v52 = vpop.permute.xlu1 %749  ;;  %v1674_v0 = vshrl.u32 %v865_v63, 7 }
 0x188   : > { %v676_v6 = vpop.f32.mrf.mxu0 }
 0x189   : > { %v704_v7 = vadd.f32 %v698_v62, %v694_v3  ;;  %v677_v8 = vadd.f32 %v676_v6, %v624_v57  ;;  %v774_v10 = vadd.f32 %v768_v59, %v764_v4  ;;  %v1360_v62 = vld [vmem:[%s1819_s11] sm:$0xff]   ;;  %v1678_v2 = vsub.s32 3, %v1674_v0  ;;  %v816_v3 = vpop.permute.xlu0 %815 }
 0x18a   : > { %v1256_v11 = vpop.f32.mrf.mxu0  ;;  %v863_v4 = vld [vmem:[%s1817_s9] sm:$0x3f]  ;;  %v872_v6 = vsub.s32 4, %v1674_v0 }
 0x18b   : > { %v695_v13 = vmul.f32 %v692_v60, %v677_v8  ;;  %v776_v14 = vmul.f32 %v774_v10, %v674_v1  ;;  %v765_v15 = vmul.f32 %v762_v53, %v677_v8  ;;  %v706_v16 = vmul.f32 %v704_v7, %v674_v1  ;;  %v810_v60 = vld [vmem:[%s1815_s7] sm:$0xf] }
 0x18c   : > { %v1688_v7 = vsub.s32 2, %v1674_v0 }
 0x18d   : > { %v705_v18 = vadd.f32 %v702_v12, %v695_v13  ;;  %v786_v19 = vadd.f32 %v780_v55, %v776_v14  ;;  %v775_v20 = vadd.f32 %v772_v54, %v765_v15  ;;  %v716_v25 = vadd.f32 %v710_v5, %v706_v16  ;;  %v864_v5 = vld [vmem:[%s1818_s10] sm:$0xf] }
 0x18e   : > { %v902_v12 = vrot.slane %v864_v5, %v1678_v2  ;;  %v873_v15 = vrot.slane %v863_v4, %v872_v6  ;;  %v1699_v16 = vsub.s32 1, %v1674_v0 }
 0x18f   : > { %v707_v22 = vmul.f32 %v705_v18, %v677_v8  ;;  %v788_v23 = vmul.f32 %v786_v19, %v674_v1  ;;  %v777_v24 = vmul.f32 %v775_v20, %v677_v8  ;;  %v718_v32 = vmul.f32 %v716_v25, %v674_v1 }
 0x190   : > { %v907_v18 = vrot.slane %v864_v5, %v1688_v7 }
 0x191   : > { %v717_v26 = vadd.f32 %v714_v21, %v707_v22  ;;  %v798_v27 = vadd.f32 %v792_v56, %v788_v23  ;;  %v787_v28 = vadd.f32 %v784_v61, %v777_v24  ;;  %v728_v39 = vadd.f32 %v722_v36, %v718_v32  ;;  %v1359_v61 = vld [vmem:[%s1819_s11 + $0x8] sm:$0xff]  }
 0x192   : > { %1264 = vmatpush3.bf16.msra.mxu0 %v1359_v61  ;;  %v879_v23 = vrot.slane %v863_v4, %v1678_v2 }
 0x193   : > { %v800_v29 = vmul.f32 %v798_v27, %v674_v1  ;;  %v789_v30 = vmul.f32 %v787_v28, %v677_v8  ;;  %v719_v33 = vmul.f32 %v717_v26, %v677_v8  ;;  %v730_v44 = vmul.f32 %v728_v39, %v674_v1  ;;  %1265 = vmatprep.subr.bf16.mxu0 %v1443_v9 }
 0x194   : > { %v913_v26 = vrot.slane %v864_v5, %v1699_v16 }
 0x195   : > { %v802_v34 = vand.u32 2147483647, %v800_v29  ;;  %v799_v35 = vadd.f32 %v796_v58, %v789_v30  ;;  %v729_v40 = vadd.f32 %v726_v31, %v719_v33  ;;  %v740_v48 = vadd.f32 %v734_v42, %v730_v44 }
 0x196   : > { %1266 = vmatpush3.bf16.msra.mxu0 %v1360_v62 }
 0x197   : > { %v804_v37 = vadd.f32 1.0, %v802_v34  ;;  %v801_v38 = vmul.f32 %v799_v35, %v677_v8  ;;  %v731_v45 = vmul.f32 %v729_v40, %v677_v8  ;;  %v742_v50 = vmul.f32 %v740_v48, %v674_v1 }
 0x198   : > { %v867_v1 = vsub.s32 5, %v1674_v0  ;;  %v885_v34 = vrot.slane %v863_v4, %v1688_v7 }
 0x199   : > { %v803_v41 = vand.u32 2147483647, %v801_v38  ;;  %1367 = vrcp.f32 %v804_v37  ;;  %v741_v49 = vadd.f32 %v738_v46, %v731_v45  ;;  %v752_v54 = vadd.f32 %v746_v47, %v742_v50  ;;  %v1362_v50 = vld [vmem:[%s1823_s15 + $0x10] sm:$0xff]  }
 0x19a   : > { %v868_v11 = vrot.slane %v863_v4, %v867_v1 }
 0x19b   : > { %v805_v43 = vadd.f32 1.0, %v803_v41  ;;  %v743_v51 = vmul.f32 %v741_v49, %v677_v8  ;;  %v891_v41 = vrot.slane %v863_v4, %v1699_v16  ;;  %v1361_v49 = vld [vmem:[%s1823_s15 + $0x18] sm:$0xff]  }
 0x19d   : > { %1369 = vrcp.f32 %v805_v43  ;;  %v753_v55 = vadd.f32 %v750_v52, %v743_v51  ;;  %v1363_v51 = vld [vmem:[%s1823_s15 + $0x8] sm:$0xff]   ;;  %v1364_v52 = vld [vmem:[%s1823_s15] sm:$0xff]  }
 0x1a6   : > { %v1368_v53 = vpop.eup %1367 }
 0x1a7   : > { %v808_v57 = vmul.f32 %v1368_v53, %v752_v54  ;;  %v994_v53 = vld [vmem:[%s1821_s13] sm:$0x3f] }
 0x1a8   : > { %v995_v54 = vld [vmem:[%s1822_s14] sm:$0xf] }
 0x1aa   : > { %v1370_v56 = vpop.eup %1369 }
 0x1ab   : > { %v809_v58 = vmul.f32 %v1370_v56, %v753_v55  ;;  %v1225_v55 = vld [vmem:[%s1820_s12] ss:$0 sm:$0xff]  ;;  %v999_v56 = vrot.slane %v994_v53, %v867_v1 }
 0x1ad   : > { %v811_v59 = vpack.c.bf16 %v809_v58, %v808_v57  ;;  %v1033_v57 = vrot.slane %v995_v54, %v1678_v2 }
 0x1af   : > { %1258 = vmatpush3.bf16.msra.mxu1 %v811_v59  ;;  %v1004_v59 = vrot.slane %v994_v53, %v872_v6 }
 0x1b0   : > { %1271 = vmatprep.subr.bf16.mxu1 %v1443_v9 }
 0x1b2   : > { %1260 = vmatmul.mubr.msk.bf16.vlgmr.msra.gmra.mxu1 %vm818_vm3, %v810_v60  ;;  %v1038_v60 = vrot.slane %v995_v54, %v1688_v7 }
 0x1b3   : > { %1279 = vmatprep.mubr.msk.bf16.mxu1 %vm1444_vm0, %v1443_v9  ;;  %1272 = vmatpush3.bf16.msra.mxu1 %v1361_v49 }
 0x1b4   : > { %1273 = vmatprep.subr.bf16.mxu1 %v1443_v9 }
 0x1b7   : > { %1274 = vmatpush3.bf16.msra.mxu1 %v1362_v50 }
 0x1b8   : > { %1275 = vmatprep.subr.bf16.mxu1 %v1443_v9 }
 0x1bb   : > { %1276 = vmatpush3.bf16.msra.mxu1 %v1363_v51 }
 0x1bc   : > { %1277 = vmatprep.subr.bf16.mxu1 %v1443_v9 }
 0x1bf   : > { %1278 = vmatpush3.bf16.msra.mxu1 %v1364_v52 }
 0x272   : > { %v856_v8 = vpop.f32.mrf.mxu1 }
 0x273   : > { %v857_v10 = vadd.f32 %v856_v8, %v816_v3 }
 0x274   : > { %v1261_v13 = vpop.f32.mrf.mxu1 }
 0x275   : > { %v1694_v14 = vadd.f32 %v857_v10, %v1641_v17  ;;  %v1706_v17 = vsub.s32 0, %v1674_v0  ;;  %v1044_v10 = vrot.slane %v995_v54, %v1699_v16 }
 0x276   : > { %v859_v19 = vpop.f32.mrf.mxu1 }
 0x277   : > { %v869_v20 = vmul.f32 %v868_v11, %v1694_v14  ;;  %v903_v21 = vmul.f32 %v902_v12, %v1694_v14  ;;  %v919_v31 = vrot.slane %v864_v5, %v1706_v17  ;;  %v897_v44 = vrot.slane %v863_v4, %v1706_v17 }
 0x278   : > { %v1262_v22 = vpop.f32.mrf.mxu1  ;;  %v1010_v5 = vrot.slane %v994_v53, %v1678_v2  ;;  %v1050_v0 = vrot.slane %v995_v54, %v1706_v17  ;;  %v1016_v19 = vrot.slane %v994_v53, %v1688_v7 }
 0x279   : > { %v874_v24 = vadd.f32 %v873_v15, %v869_v20  ;;  %v908_v25 = vadd.f32 %v907_v18, %v903_v21 }
 0x27b   : > { %v875_v27 = vmul.f32 %v874_v24, %v1694_v14  ;;  %v909_v28 = vmul.f32 %v908_v25, %v1694_v14  ;;  %v1022_v25 = vrot.slane %v994_v53, %v1699_v16 }
 0x27d   : > { %v880_v29 = vadd.f32 %v879_v23, %v875_v27  ;;  %v914_v30 = vadd.f32 %v913_v26, %v909_v28  ;;  %v1028_v28 = vrot.slane %v994_v53, %v1706_v17 }
 0x27f   : > { %v915_v32 = vmul.f32 %v914_v30, %v1694_v14  ;;  %v881_v33 = vmul.f32 %v880_v29, %v1694_v14 }
 0x281   : > { %v920_v35 = vadd.f32 %v919_v31, %v915_v32  ;;  %v886_v37 = vadd.f32 %v885_v34, %v881_v33  ;;  %v1229_v32 = vld [vmem:[%s1824_s16] ss:$0 sm:$0xff] }
 0x283   : > { %v921_v36 = vmul.f32 %v920_v35, %v1694_v14  ;;  %v887_v40 = vmul.f32 %v886_v37, %v1694_v14 }
 0x285   : > { %v922_v38 = vand.u32 2147483647, %v921_v36  ;;  %v892_v42 = vadd.f32 %v891_v41, %v887_v40 }
 0x287   : > { %v923_v39 = vadd.f32 1.0, %v922_v38  ;;  %v893_v43 = vmul.f32 %v892_v42, %v1694_v14 }
 0x289   : > { %1371 = vrcp.f32 %v923_v39  ;;  %v898_v45 = vadd.f32 %v897_v44, %v893_v43 }
 0x296   : > { %v1372_v46 = vpop.eup %1371 }
 0x297   : > { %v925_v47 = vmul.f32 %v1372_v46, %v898_v45 }
 0x299   : > { %v926_v48 = vpack.c.bf16 %v925_v47, %v925_v47 }
 0x29b   : > { %1268 = vmatmul.mubr.msk.bf16.vlgmr.msra.gmra.mxu0 %vm950_vm4, %v926_v48 }
 0x35b   : > { %v988_v58 = vpop.f32.mrf.mxu0 }
 0x35c   : > { %v989_v9 = vadd.f32 %v1225_v55, %v988_v58 }
 0x35d   : > { %v1269_v61 = vpop.f32.mrf.mxu0 }
 0x35e   : > { %v1000_v62 = vmul.f32 %v999_v56, %v989_v9  ;;  %v1034_v63 = vmul.f32 %v1033_v57, %v989_v9 }
 0x35f   : > { %v991_v3 = vpop.f32.mrf.mxu0 }
 0x360   : > { %v1005_v4 = vadd.f32 %v1004_v59, %v1000_v62  ;;  %v1039_v8 = vadd.f32 %v1038_v60, %v1034_v63 }
 0x361   : > { %v1270_v1 = vpop.f32.mrf.mxu0 }
 0x362   : > { %v1006_v11 = vmul.f32 %v1005_v4, %v989_v9  ;;  %v1040_v12 = vmul.f32 %v1039_v8, %v989_v9 }
 0x364   : > { %v1011_v13 = vadd.f32 %v1010_v5, %v1006_v11  ;;  %v1045_v15 = vadd.f32 %v1044_v10, %v1040_v12 }
 0x366   : > { %v1046_v6 = vmul.f32 %v1045_v15, %v989_v9  ;;  %v1012_v18 = vmul.f32 %v1011_v13, %v989_v9 }
 0x368   : > { %v1051_v20 = vadd.f32 %v1050_v0, %v1046_v6  ;;  %v1017_v22 = vadd.f32 %v1016_v19, %v1012_v18 }
 0x36a   : > { %v1052_v21 = vmul.f32 %v1051_v20, %v989_v9  ;;  %v1018_v24 = vmul.f32 %v1017_v22, %v989_v9 }
 0x36c   : > { %v1053_v23 = vand.u32 2147483647, %v1052_v21  ;;  %v1023_v26 = vadd.f32 %v1022_v25, %v1018_v24 }
 0x36e   : > { %v1054_v2 = vadd.f32 1.0, %v1053_v23  ;;  %v1024_v27 = vmul.f32 %v1023_v26, %v989_v9 }
 0x370   : > { %1373 = vrcp.f32 %v1054_v2  ;;  %v1029_v29 = vadd.f32 %v1028_v28, %v1024_v27 }
 0x37d   : > { %v1374_v30 = vpop.eup %1373 }
 0x37e   : > { %v1056_v31 = vmul.f32 %v1374_v30, %v1029_v29 }
 0x380   : > { %v1057_v7 = vpack.c.bf16 %v1056_v31, %v1056_v31 }
 0x382   : > { %1280 = vmatmul.mubr.msk.bf16.vlgmr.msra.gmra.mxu1 %vm1097_vm5, %v1057_v7 }
 0x442   : > { %v1135_v33 = vpop.f32.mrf.mxu1 }
 0x443   : > { %v1136_v16 = vadd.f32 %v1229_v32, %v1135_v33 }
 0x444   : > { %v1281_v34 = vpop.f32.mrf.mxu1 }
 0x445   : > { %v1141_v17 = vadd.f32 %v1136_v16, %v1694_v14 }
 0x446   : > { %v1138_v35 = vpop.f32.mrf.mxu1 }
 0x447   : > { %1142 = vst.msk [vmem:[%s539_s30] sm:$0xff] %vm950_vm4, %v1141_v17 }
 0x448   : > { %v1282_v36 = vpop.f32.mrf.mxu1 }
 0x449   : > { %1388 = shalt.err (!%p1385_p3)
}
 0x44a   : > { %s1389_s29 = scalar_lea.hbm %s1766_s5, 128  ;;  %s1393_s21 = scalar_lea.hbm %s1825_s17, 256 }
 0x44b   : > { %p1390_p4 = scmp.ne.s32.totalorder %s1766_s5, %s1389_s29  ;;  %p1394_p9 = scmp.lt.s32.totalorder %s1766_s5, %s1825_s17 }
 0x44c   : > { %p1395_p10 = scmp.lt.s32.totalorder %s1393_s21, %s1389_s29 }
 0x44d   : > { %p1391_p7 = pnand %p1390_p4, %p1574_p5 }
 0x44e   : > { %p1396_p11 = por %p1395_p10, %p1394_p9 }
 0x44f   : > { %p1392_p8 = pneg %p1391_p7 }
 0x451   : > { %p1397_p12 = pnand %p1396_p11, %p1392_p8 }
 0x453   : > { %1400 = shalt.err (!%p1397_p12)
}
 0x454   : > { %1283 = dma.vmem_to_hbm [thread:$0]  (%p1574_p5), %s1768_s18, 128, %s1766_s5, %s1144_s28  }
 0x455 PF: > { %p1289_p13 = scmp.ge.s32.totalorder %s1435_s27, 2  ;;  %s1169_s3 = sand.u32 1, %s1423_s24  }
 0x456   : > { %s1170_s6 = scalar_lea.sflag [#allocation3], %s1169_s3 }
 0x457   : > { %p1286_p0 = pnand %p1289_p13, %p1578_p6 }
 0x459   : > { %p1287_p1 = pneg %p1286_p0 }
 0x45b   : > { %1418 = dma.done.wait (%p1287_p1), %s1170_s6, 128  }
 0x45c   : > { %1420 = vsyncadd (%p1287_p1), %s1170_s6, 4294967168  ;;  %p27_p2 = scmp.ge.s32.totalorder %s1561_s0, 4   ;;  %s1842_s24 = smov %s1427_s25 }
 0x45d   : > { %s1843_s25 = smov %s1431_s26  ;;  %s1844_s26 = smov %s1572_s19 }
 0x45e   : > { %s1845_s27 = smov %s1561_s0  ;;  %29 = sbr.rel (!%p27_p2) target bundleno = 11 (0xb), region = 123 }
 0x463   :  { %1175 = vsyncpa [#allocation3], 1 }
 0x464   :  { %1177 = vsyncpa [#allocation3 + $0x1], 1 }

// kernel: tpu_custom_call.1
= control target key start
LH: loop header
LB: loop body
LE: loop exit
PB: predicated region body
PF: predicated region fallthrough
CT: control target
= control target key end

     0   :  { %s1808_s0 = inlined_call_operand.vmem [shape: f32[2,8,32], index: 0, kind: input, shape index: {}]   ;;  %s1809_s1 = inlined_call_operand.vmem [shape: f32[8,6], index: 1, kind: input, shape index: {}]   ;;  %s1810_s2 = inlined_call_operand.vmem [shape: f32[8,4], index: 2, kind: input, shape index: {}]   ;;  %s1811_s3 = inlined_call_operand.vmem [shape: bf16[16,8], index: 3, kind: input, shape index: {}]   ;;  %s1812_s4 = inlined_call_operand.vmem [shape: f32[16,1], index: 4, kind: input, shape index: {}]   ;;  %s1813_s5 = inlined_call_operand.vmem [shape: f32[16,6], index: 5, kind: input, shape index: {}]   ;;  %s1814_s6 = inlined_call_operand.vmem [shape: f32[16,4], index: 6, kind: input, shape index: {}]   ;;  %s1815_s7 = inlined_call_operand.vmem [shape: bf16[8,16], index: 7, kind: input, shape index: {}]   ;;  %s1816_s8 = inlined_call_operand.vmem [shape: f32[8,1], index: 8, kind: input, shape index: {}]   ;;  %s1817_s9 = inlined_call_operand.vmem [shape: f32[6,32], index: 9, kind: input, shape index: {}]   ;;  %s1818_s10 = inlined_call_operand.vmem [shape: f32[4,32], index: 10, kind: input, shape index: {}]   ;;  %s1819_s11 = inlined_call_operand.vmem [shape: bf16[32,64], index: 11, kind: input, shape index: {}]   ;;  %s1820_s12 = inlined_call_operand.vmem [shape: f32[1,64], index: 12, kind: input, shape index: {}]   ;;  %s1821_s13 = inlined_call_operand.vmem [shape: f32[6,64], index: 13, kind: input, shape index: {}]   ;;  %s1822_s14 = inlined_call_operand.vmem [shape: f32[4,64], index: 14, kind: input, shape index: {}]   ;;  %s1823_s15 = inlined_call_operand.vmem [shape: bf16[64,32], index: 15, kind: input, shape index: {}]   ;;  %s1824_s16 = inlined_call_operand.vmem [shape: f32[1,32], index: 16, kind: input, shape index: {}]   ;;  %s1825_s17 = inlined_call_operand.hbm [shape: f32[2,8,32], index: 17, kind: output, shape index: {}]  }
   0x1   :  { %1826 = sst [smem:[#allocation5_spill]] %s1808_s0 }
   0x2   :  { %1827 = sst [smem:[#allocation6_spill]] %s1809_s1 }
   0x3   :  { %1828 = sst [smem:[#allocation7_spill]] %s1810_s2 }
   0x4   :  { %1829 = sst [smem:[#allocation8_spill]] %s1811_s3 }
   0x5   :  { %1830 = sst [smem:[#allocation9_spill]] %s1812_s4 }
   0x6   :  { %1831 = sst [smem:[#allocation10_spill]] %s1813_s5 }
   0x7   :  { %1832 = sst [smem:[#allocation11_spill]] %s1814_s6 }
   0x8   :  { %22 = vsyncpa [#allocation3], 0 }
   0x9   :  { %24 = vsyncpa [#allocation3 + $0x1], 0  ;;  %s1536_s24 = smov 0   ;;  %s1538_s25 = smov 0  }
   0xa   :  { %s1540_s26 = smov 0   ;;  %s1542_s27 = smov 0  }
   0xb LB: > { %s1557_s28 = sadd.s32 4294967295, %s1435_s27   ;;  %s1216_s29 = sadd.s32 4294967294, %s1435_s27   ;;  %s1435_s27 = sphi %s1542_s27, %s1845_s27   ;;  %s1431_s26 = sphi %s1540_s26, %s1844_s26   ;;  %s1427_s25 = sphi %s1538_s25, %s1843_s25   ;;  %s1423_s24 = sphi %s1536_s24, %s1842_s24  }
   0xc   : > { %s1561_s0 = sadd.s32 1, %s1435_s27   ;;  %s399_s30 = sadd.s32 1, %s1431_s26 }
   0xd   : > { %s396_s18 = ssub.s32 %s1435_s27, %s1561_s0  ;;  %p409_p0 = scmp.ne.s32.totalorder %s1431_s26, %s1427_s25 }
   0xe   : > { %p397_p1 = scmp.eq.s32.totalorder %s396_s18, 0  ;;  %p410_p2 = scmp.eq.s32.totalorder %s1557_s28, 1 }
   0xf   : > { %p415_p3 = scmp.ne.s32.totalorder %s1427_s25, %s1423_s24  ;;  %p416_p4 = scmp.eq.s32.totalorder %s1216_s29, 1 }
  0x10   : > { %s1572_s19 = scalar_select %p397_p1, %s1431_s26, %s399_s30  }
  0x11   : > { %p1574_p5 = por %p410_p2, %p409_p0  ;;  %p1578_p6 = por %p416_p4, %p415_p3 }
  0x12   : > { %p1219_p7 = scmp.ge.s32.totalorder %s1435_s27, 1  ;;  %p489_p8 = scmp.lt.s32.totalorder %s1435_s27, 3 }
  0x14   : > { %p490_p9 = pnand %p1219_p7, %p489_p8 }
  0x15   : > { %s1835_s2 = sld [smem:[#allocation7_spill]] (!%p490_p9)  ;;  %p540_p10 = scmp.lt.s32.totalorder (!%p490_p9), %s1557_s28, 1 }
  0x16   : > { %493 = sbr.rel (%p490_p9) target bundleno = 1109 (0x455), region = 88  ;;  %s1836_s30 = sld [smem:[#allocation6_spill]] (!%p490_p9) }
  0x17   : > { %s1837_s4 = sld [smem:[#allocation9_spill]] (!%p490_p9)  ;;  %s1445_s22 = smov (!%p490_p9), [#allocation2]  }
  0x18   : > { %s1838_s6 = sld [smem:[#allocation11_spill]] (!%p490_p9)  ;;  %s1379_s23 = sshll.u32 (!%p490_p9), %s1445_s22, 4  ;;  %s1380_s23 = int_to_ptr.vmem [resolvable:$false] %s1379_s23 }
  0x19   : > { %s1839_s5 = sld [smem:[#allocation10_spill]] (!%p490_p9) }
  0x1a   : > { %s1840_s29 = sld [smem:[#allocation5_spill]] (!%p490_p9) }
  0x1b   : > { %v547_v0 = vld [vmem:[%s1835_s2] sm:$0xff]  ;;  %v1437_v1 = vmov 3   ;;  %v1438_v2 = vmov 1   ;;  %v1439_v3 = vmov 2   ;;  %v1440_v4 = vmov 0   ;;  %s541_s18 = scalar_select %p540_p10, %s1557_s28, 1 }
  0x1c   : > { %1330 = vset.pattern.permute.xlu0 %v1437_v1  ;;  %1332 = vset.pattern.permute.xlu1 %v1438_v2  ;;  %v546_v5 = vld [vmem:[%s1836_s30] sm:$0xff]  ;;  %v1441_v6 = vmov 5   ;;  %v1442_v7 = vmov 4   ;;  %v1443_v9 = vmov 0.0   ;;  %vm1444_vm0 = vmmov 0   ;;  %s1841_s3 = sld [smem:[#allocation8_spill]] }
  0x1d   : > { %585 = vperm.xlu0 %1330, %v547_v0   ;;  %596 = vperm.xlu1 %1332, %v547_v0   ;;  %v614_v8 = vld [vmem:[%s1837_s4] sm:$0xff]  ;;  %v615_v11 = vld [vmem:[%s1837_s4 + $0x8] sm:$0xff]  ;;  %s1221_s21 = sshll.u32 %s541_s18, 3  ;;  %vm635_vm1 = vcmask 1043456   ;;  %vm631_vm2 = vcmask 64512   ;;  %vm818_vm3 = vcmask 130048  }
  0x1e   : > { %1251 = vmatprep.subr.bf16.mxu0 %v1443_v9  ;;  %1257 = vmatprep.subr.bf16.mxu1 %v1443_v9  ;;  %v682_v10 = vld [vmem:[%s1838_s6] sm:$0xff]  ;;  %v683_v12 = vld [vmem:[%s1838_s6 + $0x8] sm:$0xff]  ;;  %vm950_vm4 = vcmask 261120   ;;  %vm1097_vm5 = vcmask 523264   ;;  %s537_s2 = sand.u32 1, %s1427_s25   ;;  %s1381_s4 = scalar_lea.vmem %s1380_s23, 256 }
  0x1f   : > { %1253 = vmatprep.mubr.msk.bf16.mxu0 %vm1444_vm0, %v1443_v9  ;;  %1259 = vmatprep.mubr.msk.bf16.mxu1 %vm1444_vm0, %v1443_v9  ;;  %v680_v13 = vld [vmem:[%s1839_s5] sm:$0xff]  ;;  %v681_v14 = vld [vmem:[%s1839_s5 + $0x8] sm:$0xff] }
  0x20   : > { %s543_s30 = scalar_lea.vmem %s1840_s29, %s1221_s21  ;;  %v812_v50 = vld [vmem:[%s1816_s8] sm:$0xff]  ;;  %s1236_s29 = sshll.u32 %s1557_s28, 7 }
  0x21   : > { %1331 = vset.pattern.permute.xlu0 %v1439_v3  ;;  %1333 = vset.pattern.permute.xlu1 %v1440_v4  ;;  %v1641_v17 = vld [vmem:[%s543_s30] sm:$0xff]  ;;  %s1766_s5 = scalar_lea.hbm %s1825_s17, %s1236_s29  ;;  %s1144_s28 = scalar_lea.sflag [#allocation3], %s537_s2 }
  0x22   : > { %590 = vperm.xlu0 %1331, %v547_v0   ;;  %602 = vperm.xlu1 %1333, %v547_v0   ;;  %v1358_v49 = vld [vmem:[%s1841_s3] sm:$0xff]   ;;  %s1220_s3 = sshll.u32 %s537_s2, 3 }
  0x23   : > { %s539_s30 = scalar_lea.vmem [#allocation2], %s1220_s3 }
  0x24   : > { %s1157_s18 = sshll.u32 %s539_s30, 4  ;;  %s1768_s18 = int_to_ptr.vmem [resolvable:$true] %s1157_s18 }
  0x25   : > { %s1375_s3 = scalar_lea.vmem %s1768_s18, 128  ;;  %p1382_p0 = scmp.lt.s32.totalorder %s1768_s18, %s1380_s23 }
  0x26   : > { %1334 = vset.pattern.permute.xlu1 %v1441_v6  ;;  %1335 = vset.pattern.permute.xlu0 %v1442_v7  ;;  %p1376_p11 = scmp.ne.s32.totalorder %s1768_s18, %s1375_s3  ;;  %p1383_p1 = scmp.lt.s32.totalorder %s1381_s4, %s1375_s3 }
  0x27   : > { %550 = vperm.xlu1 %1334, %v546_v5   ;;  %555 = vperm.xlu0 %1335, %v546_v5  }
  0x28   : > { %p1377_p12 = pnand %p1376_p11, %p1574_p5  ;;  %p1384_p2 = por %p1383_p1, %p1382_p0 }
  0x2a   : > { %p1378_p13 = pneg %p1377_p12 }
  0x2b   : > { %1336 = vset.pattern.permute.xlu1 %v1437_v1  ;;  %1338 = vset.pattern.permute.xlu0 %v1438_v2 }
  0x2c   : > { %561 = vperm.xlu1 %1336, %v546_v5   ;;  %573 = vperm.xlu0 %1338, %v546_v5   ;;  %p1385_p3 = pnand %p1384_p2, %p1378_p13 }
  0x30   : > { %1337 = vset.pattern.permute.xlu1 %v1439_v3  ;;  %1340 = vset.pattern.permute.xlu0 %v1440_v4 }
  0x31   : > { %567 = vperm.xlu1 %1337, %v546_v5   ;;  %623 = vperm.xlu0 %1340, %v615_v11  }
  0x35   : > { %1339 = vset.pattern.permute.xlu1 %v1440_v4  ;;  %1342 = vset.pattern.permute.xlu0 %v1439_v3 }
  0x36   : > { %579 = vperm.xlu1 %1339, %v546_v5   ;;  %767 = vperm.xlu0 %1342, %v682_v10  }
  0x3a   : > { %618 = vperm.xlu1 %1339, %v614_v8   ;;  %1345 = vset.pattern.permute.xlu0 %v1438_v2 }
  0x3b   : > { %783 = vperm.xlu0 %1345, %v683_v12  }
  0x3e   : > { %1341 = vset.pattern.permute.xlu1 %v1437_v1 }
  0x3f   : > { %756 = vperm.xlu1 %1341, %v682_v10   ;;  %1347 = vset.pattern.permute.xlu0 %v1441_v6 }
  0x40   : > { %686 = vperm.xlu0 %1347, %v680_v13  }
  0x43   : > { %761 = vperm.xlu1 %1341, %v683_v12  }
  0x44   : > { %1350 = vset.pattern.permute.xlu0 %v1442_v7 }
  0x45   : > { %701 = vperm.xlu0 %1350, %v681_v14  }
  0x47   : > { %1343 = vset.pattern.permute.xlu1 %v1439_v3 }
  0x48   : > { %771 = vperm.xlu1 %1343, %v683_v12  }
  0x49   : > { %1352 = vset.pattern.permute.xlu0 %v1439_v3 }
  0x4a   : > { %721 = vperm.xlu0 %1352, %v680_v13  }
  0x4c   : > { %1344 = vset.pattern.permute.xlu1 %v1438_v2 }
  0x4d   : > { %779 = vperm.xlu1 %1344, %v682_v10  }
  0x4e   : > { %1355 = vset.pattern.permute.xlu0 %v1438_v2 }
  0x4f   : > { %737 = vperm.xlu0 %1355, %v681_v14  }
  0x51   : > { %1346 = vset.pattern.permute.xlu1 %v1440_v4 }
  0x52   : > { %791 = vperm.xlu1 %1346, %v682_v10  }
  0x53   : > { %1357 = vset.pattern.permute.xlu0 %v1440_v4 }
  0x54   : > { %815 = vperm.xlu0 %1357, %v812_v50  }
  0x56   : > { %795 = vperm.xlu1 %1346, %v683_v12  }
  0x5a   : > { %1348 = vset.pattern.permute.xlu1 %v1441_v6 }
  0x5b   : > { %691 = vperm.xlu1 %1348, %v681_v14  }
  0x5f   : > { %1349 = vset.pattern.permute.xlu1 %v1442_v7 }
  0x60   : > { %697 = vperm.xlu1 %1349, %v680_v13  }
  0x64   : > { %1351 = vset.pattern.permute.xlu1 %v1437_v1 }
  0x65   : > { %709 = vperm.xlu1 %1351, %v680_v13  }
  0x69   : > { %713 = vperm.xlu1 %1351, %v681_v14  }
  0x6d   : > { %1353 = vset.pattern.permute.xlu1 %v1439_v3 }
  0x6e   : > { %725 = vperm.xlu1 %1353, %v681_v14  }
  0x72   : > { %1354 = vset.pattern.permute.xlu1 %v1438_v2 }
  0x73   : > { %733 = vperm.xlu1 %1354, %v680_v13  }
  0x77   : > { %1356 = vset.pattern.permute.xlu1 %v1440_v4 }
  0x78   : > { %745 = vperm.xlu1 %1356, %v680_v13  }
  0x7c   : > { %749 = vperm.xlu1 %1356, %v681_v14  }
  0x98   : > { %v586_v15 = vpop.permute.xlu0 %585  ;;  %v597_v16 = vpop.permute.xlu1 %596 }
  0x99   : > { %v588_v18 = vmul.f32 %v586_v15, %v1641_v17 }
  0x9d   : > { %v591_v19 = vpop.permute.xlu0 %590  ;;  %v603_v20 = vpop.permute.xlu1 %602 }
  0x9e   : > { %v593_v21 = vadd.f32 %v591_v19, %v588_v18 }
  0xa0   : > { %v594_v22 = vmul.f32 %v593_v21, %v1641_v17 }
  0xa2   : > { %v599_v23 = vadd.f32 %v597_v16, %v594_v22  ;;  %v551_v24 = vpop.permute.xlu1 %550  ;;  %v556_v25 = vpop.permute.xlu0 %555 }
  0xa3   : > { %v553_v26 = vmul.f32 %v551_v24, %v1641_v17 }
  0xa4   : > { %v600_v27 = vmul.f32 %v599_v23, %v1641_v17 }
  0xa5   : > { %v558_v28 = vadd.f32 %v556_v25, %v553_v26 }
  0xa6   : > { %v605_v29 = vadd.f32 %v603_v20, %v600_v27 }
  0xa7   : > { %v562_v30 = vpop.permute.xlu1 %561  ;;  %v559_v31 = vmul.f32 %v558_v28, %v1641_v17  ;;  %v574_v39 = vpop.permute.xlu0 %573 }
  0xa8   : > { %v606_v32 = vmul.f32 %v605_v29, %v1641_v17 }
  0xa9   : > { %v564_v33 = vadd.f32 %v562_v30, %v559_v31 }
  0xaa   : > { %v607_v34 = vand.u32 2147483647, %v606_v32 }
  0xab   : > { %v565_v35 = vmul.f32 %v564_v33, %v1641_v17 }
  0xac   : > { %v608_v36 = vadd.f32 1.0, %v607_v34  ;;  %v568_v37 = vpop.permute.xlu1 %567  ;;  %v624_v57 = vpop.permute.xlu0 %623 }
  0xad   : > { %v570_v38 = vadd.f32 %v568_v37, %v565_v35 }
  0xae   : > { %1365 = vrcp.f32 %v608_v36 }
  0xaf   : > { %v571_v40 = vmul.f32 %v570_v38, %v1641_v17 }
  0xb1   : > { %v576_v41 = vadd.f32 %v574_v39, %v571_v40  ;;  %v580_v43 = vpop.permute.xlu1 %579  ;;  %v768_v59 = vpop.permute.xlu0 %767 }
  0xb3   : > { %v577_v42 = vmul.f32 %v576_v41, %v1641_v17 }
  0xb5   : > { %v582_v44 = vadd.f32 %v580_v43, %v577_v42  ;;  %v619_v51 = vpop.permute.xlu1 %618 }
  0xb6   : > { %v784_v61 = vpop.permute.xlu0 %783 }
  0xba   : > { %v757_v52 = vpop.permute.xlu1 %756 }
  0xbb   : > { %v1366_v45 = vpop.eup %1365  ;;  %v687_v0 = vpop.permute.xlu0 %686 }
  0xbc   : > { %v610_v46 = vmul.f32 %v1366_v45, %v582_v44 }
  0xbe   : > { %v613_v47 = vpack.c.bf16 %v610_v46, %v610_v46  ;;  %v762_v53 = vpop.permute.xlu1 %761 }
  0xc0   : > { %v637_v48 = vsel %vm635_vm1, %v613_v47, 0  ;;  %v702_v12 = vpop.permute.xlu0 %701 }
  0xc1   : > { %1252 = vmatpush3.bf16.msra.mxu0 %v637_v48 }
  0xc2   : > { %1263 = vmatprep.subr.bf16.mxu0 %v1443_v9 }
  0xc3   : > { %v772_v54 = vpop.permute.xlu1 %771 }
  0xc4   : > { %1254 = vmatmul.mubr.msk.bf16.vlgmr.msra.gmra.mxu0 %vm631_vm2, %v1358_v49 }
  0xc5   : > { %1267 = vmatprep.mubr.msk.bf16.mxu0 %vm1444_vm0, %v1443_v9  ;;  %v722_v36 = vpop.permute.xlu0 %721 }
  0xc8   : > { %v780_v55 = vpop.permute.xlu1 %779 }
  0xca   : > { %v738_v46 = vpop.permute.xlu0 %737 }
  0xcd   : > { %v792_v56 = vpop.permute.xlu1 %791 }
  0xd1   : > { %v796_v58 = vpop.permute.xlu1 %795 }
  0xd6   : > { %v692_v60 = vpop.permute.xlu1 %691 }
  0xdb   : > { %v698_v62 = vpop.permute.xlu1 %697 }
  0xe0   : > { %v710_v5 = vpop.permute.xlu1 %709 }
  0xe4   : > { %v714_v21 = vpop.permute.xlu1 %713 }
  0xe9   : > { %v726_v31 = vpop.permute.xlu1 %725 }
  0xee   : > { %v734_v42 = vpop.permute.xlu1 %733 }
  0xf3   : > { %v746_v47 = vpop.permute.xlu1 %745 }
 0x184   : > { %v673_v63 = vpop.f32.mrf.mxu0 }
 0x185   : > { %v674_v1 = vadd.f32 %v673_v63, %v619_v51  ;;  %v865_v63 = vlaneseq }
 0x186   : > { %v1255_v2 = vpop.f32.mrf.mxu0 }
 0x187   : > { %v694_v3 = vmul.f32 %v687_v0, %v674_v1  ;;  %v764_v4 = vmul.f32 %v757_v52, %v674_v1  ;;  %v750_v52 = vpop.permute.xlu1 %749  ;;  %v1674_v0 = vshrl.u32 %v865_v63, 7 }
 0x188   : > { %v676_v6 = vpop.f32.mrf.mxu0 }
 0x189   : > { %v704_v7 = vadd.f32 %v698_v62, %v694_v3  ;;  %v677_v8 = vadd.f32 %v676_v6, %v624_v57  ;;  %v774_v10 = vadd.f32 %v768_v59, %v764_v4  ;;  %v1360_v62 = vld [vmem:[%s1819_s11] sm:$0xff]   ;;  %v1678_v2 = vsub.s32 3, %v1674_v0  ;;  %v816_v3 = vpop.permute.xlu0 %815 }
 0x18a   : > { %v1256_v11 = vpop.f32.mrf.mxu0  ;;  %v863_v4 = vld [vmem:[%s1817_s9] sm:$0x3f]  ;;  %v872_v6 = vsub.s32 4, %v1674_v0 }
 0x18b   : > { %v695_v13 = vmul.f32 %v692_v60, %v677_v8  ;;  %v776_v14 = vmul.f32 %v774_v10, %v674_v1  ;;  %v765_v15 = vmul.f32 %v762_v53, %v677_v8  ;;  %v706_v16 = vmul.f32 %v704_v7, %v674_v1  ;;  %v810_v60 = vld [vmem:[%s1815_s7] sm:$0xf] }
 0x18c   : > { %v1688_v7 = vsub.s32 2, %v1674_v0 }
 0x18d   : > { %v705_v18 = vadd.f32 %v702_v12, %v695_v13  ;;  %v786_v19 = vadd.f32 %v780_v55, %v776_v14  ;;  %v775_v20 = vadd.f32 %v772_v54, %v765_v15  ;;  %v716_v25 = vadd.f32 %v710_v5, %v706_v16  ;;  %v864_v5 = vld [vmem:[%s1818_s10] sm:$0xf] }
 0x18e   : > { %v902_v12 = vrot.slane %v864_v5, %v1678_v2  ;;  %v873_v15 = vrot.slane %v863_v4, %v872_v6  ;;  %v1699_v16 = vsub.s32 1, %v1674_v0 }
 0x18f   : > { %v707_v22 = vmul.f32 %v705_v18, %v677_v8  ;;  %v788_v23 = vmul.f32 %v786_v19, %v674_v1  ;;  %v777_v24 = vmul.f32 %v775_v20, %v677_v8  ;;  %v718_v32 = vmul.f32 %v716_v25, %v674_v1 }
 0x190   : > { %v907_v18 = vrot.slane %v864_v5, %v1688_v7 }
 0x191   : > { %v717_v26 = vadd.f32 %v714_v21, %v707_v22  ;;  %v798_v27 = vadd.f32 %v792_v56, %v788_v23  ;;  %v787_v28 = vadd.f32 %v784_v61, %v777_v24  ;;  %v728_v39 = vadd.f32 %v722_v36, %v718_v32  ;;  %v1359_v61 = vld [vmem:[%s1819_s11 + $0x8] sm:$0xff]  }
 0x192   : > { %1264 = vmatpush3.bf16.msra.mxu0 %v1359_v61  ;;  %v879_v23 = vrot.slane %v863_v4, %v1678_v2 }
 0x193   : > { %v800_v29 = vmul.f32 %v798_v27, %v674_v1  ;;  %v789_v30 = vmul.f32 %v787_v28, %v677_v8  ;;  %v719_v33 = vmul.f32 %v717_v26, %v677_v8  ;;  %v730_v44 = vmul.f32 %v728_v39, %v674_v1  ;;  %1265 = vmatprep.subr.bf16.mxu0 %v1443_v9 }
 0x194   : > { %v913_v26 = vrot.slane %v864_v5, %v1699_v16 }
 0x195   : > { %v802_v34 = vand.u32 2147483647, %v800_v29  ;;  %v799_v35 = vadd.f32 %v796_v58, %v789_v30  ;;  %v729_v40 = vadd.f32 %v726_v31, %v719_v33  ;;  %v740_v48 = vadd.f32 %v734_v42, %v730_v44 }
 0x196   : > { %1266 = vmatpush3.bf16.msra.mxu0 %v1360_v62 }
 0x197   : > { %v804_v37 = vadd.f32 1.0, %v802_v34  ;;  %v801_v38 = vmul.f32 %v799_v35, %v677_v8  ;;  %v731_v45 = vmul.f32 %v729_v40, %v677_v8  ;;  %v742_v50 = vmul.f32 %v740_v48, %v674_v1 }
 0x198   : > { %v867_v1 = vsub.s32 5, %v1674_v0  ;;  %v885_v34 = vrot.slane %v863_v4, %v1688_v7 }
 0x199   : > { %v803_v41 = vand.u32 2147483647, %v801_v38  ;;  %1367 = vrcp.f32 %v804_v37  ;;  %v741_v49 = vadd.f32 %v738_v46, %v731_v45  ;;  %v752_v54 = vadd.f32 %v746_v47, %v742_v50  ;;  %v1362_v50 = vld [vmem:[%s1823_s15 + $0x10] sm:$0xff]  }
 0x19a   : > { %v868_v11 = vrot.slane %v863_v4, %v867_v1 }
 0x19b   : > { %v805_v43 = vadd.f32 1.0, %v803_v41  ;;  %v743_v51 = vmul.f32 %v741_v49, %v677_v8  ;;  %v891_v41 = vrot.slane %v863_v4, %v1699_v16  ;;  %v1361_v49 = vld [vmem:[%s1823_s15 + $0x18] sm:$0xff]  }
 0x19d   : > { %1369 = vrcp.f32 %v805_v43  ;;  %v753_v55 = vadd.f32 %v750_v52, %v743_v51  ;;  %v1363_v51 = vld [vmem:[%s1823_s15 + $0x8] sm:$0xff]   ;;  %v1364_v52 = vld [vmem:[%s1823_s15] sm:$0xff]  }
 0x1a6   : > { %v1368_v53 = vpop.eup %1367 }
 0x1a7   : > { %v808_v57 = vmul.f32 %v1368_v53, %v752_v54  ;;  %v994_v53 = vld [vmem:[%s1821_s13] sm:$0x3f] }
 0x1a8   : > { %v995_v54 = vld [vmem:[%s1822_s14] sm:$0xf] }
 0x1aa   : > { %v1370_v56 = vpop.eup %1369 }
 0x1ab   : > { %v809_v58 = vmul.f32 %v1370_v56, %v753_v55  ;;  %v1225_v55 = vld [vmem:[%s1820_s12] ss:$0 sm:$0xff]  ;;  %v999_v56 = vrot.slane %v994_v53, %v867_v1 }
 0x1ad   : > { %v811_v59 = vpack.c.bf16 %v809_v58, %v808_v57  ;;  %v1033_v57 = vrot.slane %v995_v54, %v1678_v2 }
 0x1af   : > { %1258 = vmatpush3.bf16.msra.mxu1 %v811_v59  ;;  %v1004_v59 = vrot.slane %v994_v53, %v872_v6 }
 0x1b0   : > { %1271 = vmatprep.subr.bf16.mxu1 %v1443_v9 }
 0x1b2   : > { %1260 = vmatmul.mubr.msk.bf16.vlgmr.msra.gmra.mxu1 %vm818_vm3, %v810_v60  ;;  %v1038_v60 = vrot.slane %v995_v54, %v1688_v7 }
 0x1b3   : > { %1279 = vmatprep.mubr.msk.bf16.mxu1 %vm1444_vm0, %v1443_v9  ;;  %1272 = vmatpush3.bf16.msra.mxu1 %v1361_v49 }
 0x1b4   : > { %1273 = vmatprep.subr.bf16.mxu1 %v1443_v9 }
 0x1b7   : > { %1274 = vmatpush3.bf16.msra.mxu1 %v1362_v50 }
 0x1b8   : > { %1275 = vmatprep.subr.bf16.mxu1 %v1443_v9 }
 0x1bb   : > { %1276 = vmatpush3.bf16.msra.mxu1 %v1363_v51 }
 0x1bc   : > { %1277 = vmatprep.subr.bf16.mxu1 %v1443_v9 }
 0x1bf   : > { %1278 = vmatpush3.bf16.msra.mxu1 %v1364_v52 }
 0x272   : > { %v856_v8 = vpop.f32.mrf.mxu1 }
 0x273   : > { %v857_v10 = vadd.f32 %v856_v8, %v816_v3 }
 0x274   : > { %v1261_v13 = vpop.f32.mrf.mxu1 }
 0x275   : > { %v1694_v14 = vadd.f32 %v857_v10, %v1641_v17  ;;  %v1706_v17 = vsub.s32 0, %v1674_v0  ;;  %v1044_v10 = vrot.slane %v995_v54, %v1699_v16 }
 0x276   : > { %v859_v19 = vpop.f32.mrf.mxu1 }
 0x277   : > { %v869_v20 = vmul.f32 %v868_v11, %v1694_v14  ;;  %v903_v21 = vmul.f32 %v902_v12, %v1694_v14  ;;  %v919_v31 = vrot.slane %v864_v5, %v1706_v17  ;;  %v897_v44 = vrot.slane %v863_v4, %v1706_v17 }
 0x278   : > { %v1262_v22 = vpop.f32.mrf.mxu1  ;;  %v1010_v5 = vrot.slane %v994_v53, %v1678_v2  ;;  %v1050_v0 = vrot.slane %v995_v54, %v1706_v17  ;;  %v1016_v19 = vrot.slane %v994_v53, %v1688_v7 }
 0x279   : > { %v874_v24 = vadd.f32 %v873_v15, %v869_v20  ;;  %v908_v25 = vadd.f32 %v907_v18, %v903_v21 }
 0x27b   : > { %v875_v27 = vmul.f32 %v874_v24, %v1694_v14  ;;  %v909_v28 = vmul.f32 %v908_v25, %v1694_v14  ;;  %v1022_v25 = vrot.slane %v994_v53, %v1699_v16 }
 0x27d   : > { %v880_v29 = vadd.f32 %v879_v23, %v875_v27  ;;  %v914_v30 = vadd.f32 %v913_v26, %v909_v28  ;;  %v1028_v28 = vrot.slane %v994_v53, %v1706_v17 }
 0x27f   : > { %v915_v32 = vmul.f32 %v914_v30, %v1694_v14  ;;  %v881_v33 = vmul.f32 %v880_v29, %v1694_v14 }
 0x281   : > { %v920_v35 = vadd.f32 %v919_v31, %v915_v32  ;;  %v886_v37 = vadd.f32 %v885_v34, %v881_v33  ;;  %v1229_v32 = vld [vmem:[%s1824_s16] ss:$0 sm:$0xff] }
 0x283   : > { %v921_v36 = vmul.f32 %v920_v35, %v1694_v14  ;;  %v887_v40 = vmul.f32 %v886_v37, %v1694_v14 }
 0x285   : > { %v922_v38 = vand.u32 2147483647, %v921_v36  ;;  %v892_v42 = vadd.f32 %v891_v41, %v887_v40 }
 0x287   : > { %v923_v39 = vadd.f32 1.0, %v922_v38  ;;  %v893_v43 = vmul.f32 %v892_v42, %v1694_v14 }
 0x289   : > { %1371 = vrcp.f32 %v923_v39  ;;  %v898_v45 = vadd.f32 %v897_v44, %v893_v43 }
 0x296   : > { %v1372_v46 = vpop.eup %1371 }
 0x297   : > { %v925_v47 = vmul.f32 %v1372_v46, %v898_v45 }
 0x299   : > { %v926_v48 = vpack.c.bf16 %v925_v47, %v925_v47 }
 0x29b   : > { %1268 = vmatmul.mubr.msk.bf16.vlgmr.msra.gmra.mxu0 %vm950_vm4, %v926_v48 }
 0x35b   : > { %v988_v58 = vpop.f32.mrf.mxu0 }
 0x35c   : > { %v989_v9 = vadd.f32 %v1225_v55, %v988_v58 }
 0x35d   : > { %v1269_v61 = vpop.f32.mrf.mxu0 }
 0x35e   : > { %v1000_v62 = vmul.f32 %v999_v56, %v989_v9  ;;  %v1034_v63 = vmul.f32 %v1033_v57, %v989_v9 }
 0x35f   : > { %v991_v3 = vpop.f32.mrf.mxu0 }
 0x360   : > { %v1005_v4 = vadd.f32 %v1004_v59, %v1000_v62  ;;  %v1039_v8 = vadd.f32 %v1038_v60, %v1034_v63 }
 0x361   : > { %v1270_v1 = vpop.f32.mrf.mxu0 }
 0x362   : > { %v1006_v11 = vmul.f32 %v1005_v4, %v989_v9  ;;  %v1040_v12 = vmul.f32 %v1039_v8, %v989_v9 }
 0x364   : > { %v1011_v13 = vadd.f32 %v1010_v5, %v1006_v11  ;;  %v1045_v15 = vadd.f32 %v1044_v10, %v1040_v12 }
 0x366   : > { %v1046_v6 = vmul.f32 %v1045_v15, %v989_v9  ;;  %v1012_v18 = vmul.f32 %v1011_v13, %v989_v9 }
 0x368   : > { %v1051_v20 = vadd.f32 %v1050_v0, %v1046_v6  ;;  %v1017_v22 = vadd.f32 %v1016_v19, %v1012_v18 }
 0x36a   : > { %v1052_v21 = vmul.f32 %v1051_v20, %v989_v9  ;;  %v1018_v24 = vmul.f32 %v1017_v22, %v989_v9 }
 0x36c   : > { %v1053_v23 = vand.u32 2147483647, %v1052_v21  ;;  %v1023_v26 = vadd.f32 %v1022_v25, %v1018_v24 }
 0x36e   : > { %v1054_v2 = vadd.f32 1.0, %v1053_v23  ;;  %v1024_v27 = vmul.f32 %v1023_v26, %v989_v9 }
 0x370   : > { %1373 = vrcp.f32 %v1054_v2  ;;  %v1029_v29 = vadd.f32 %v1028_v28, %v1024_v27 }
 0x37d   : > { %v1374_v30 = vpop.eup %1373 }
 0x37e   : > { %v1056_v31 = vmul.f32 %v1374_v30, %v1029_v29 }
 0x380   : > { %v1057_v7 = vpack.c.bf16 %v1056_v31, %v1056_v31 }
 0x382   : > { %1280 = vmatmul.mubr.msk.bf16.vlgmr.msra.gmra.mxu1 %vm1097_vm5, %v1057_v7 }
 0x442   : > { %v1135_v33 = vpop.f32.mrf.mxu1 }
 0x443   : > { %v1136_v16 = vadd.f32 %v1229_v32, %v1135_v33 }
 0x444   : > { %v1281_v34 = vpop.f32.mrf.mxu1 }
 0x445   : > { %v1141_v17 = vadd.f32 %v1136_v16, %v1694_v14 }
 0x446   : > { %v1138_v35 = vpop.f32.mrf.mxu1 }
 0x447   : > { %1142 = vst.msk [vmem:[%s539_s30] sm:$0xff] %vm950_vm4, %v1141_v17 }
 0x448   : > { %v1282_v36 = vpop.f32.mrf.mxu1 }
 0x449   : > { %1388 = shalt.err (!%p1385_p3)
}
 0x44a   : > { %s1389_s29 = scalar_lea.hbm %s1766_s5, 128  ;;  %s1393_s21 = scalar_lea.hbm %s1825_s17, 256 }
 0x44b   : > { %p1390_p4 = scmp.ne.s32.totalorder %s1766_s5, %s1389_s29  ;;  %p1394_p9 = scmp.lt.s32.totalorder %s1766_s5, %s1825_s17 }
 0x44c   : > { %p1395_p10 = scmp.lt.s32.totalorder %s1393_s21, %s1389_s29 }
 0x44d   : > { %p1391_p7 = pnand %p1390_p4, %p1574_p5 }
 0x44e   : > { %p1396_p11 = por %p1395_p10, %p1394_p9 }
 0x44f   : > { %p1392_p8 = pneg %p1391_p7 }
 0x451   : > { %p1397_p12 = pnand %p1396_p11, %p1392_p8 }
 0x453   : > { %1400 = shalt.err (!%p1397_p12)
}
 0x454   : > { %1283 = dma.vmem_to_hbm [thread:$0]  (%p1574_p5), %s1768_s18, 128, %s1766_s5, %s1144_s28  }
 0x455 PF: > { %p1289_p13 = scmp.ge.s32.totalorder %s1435_s27, 2  ;;  %s1169_s3 = sand.u32 1, %s1423_s24  }
 0x456   : > { %s1170_s6 = scalar_lea.sflag [#allocation3], %s1169_s3 }
 0x457   : > { %p1286_p0 = pnand %p1289_p13, %p1578_p6 }
 0x459   : > { %p1287_p1 = pneg %p1286_p0 }
 0x45b   : > { %1418 = dma.done.wait (%p1287_p1), %s1170_s6, 128  }
 0x45c   : > { %1420 = vsyncadd (%p1287_p1), %s1170_s6, 4294967168  ;;  %p27_p2 = scmp.ge.s32.totalorder %s1561_s0, 4   ;;  %s1842_s24 = smov %s1427_s25 }
 0x45d   : > { %s1843_s25 = smov %s1431_s26  ;;  %s1844_s26 = smov %s1572_s19 }
 0x45e   : > { %s1845_s27 = smov %s1561_s0  ;;  %29 = sbr.rel (!%p27_p2) target bundleno = 11 (0xb), region = 123 }
 0x463   :  { %1175 = vsyncpa [#allocation3], 1 }
 0x464   :  { %1177 = vsyncpa [#allocation3 + $0x1], 1 }

</bundles_post_ra>
